<compile_context>
chip_gen: v7x
topology: tpu7x:2x2x1
jax: 0.10.0
libtpu: 0.0.40
codegen_flags: <defaults>
</compile_context>

<pallas_src>
import functools
import math

import jax
import jax.numpy as jnp
from jax.experimental import pallas as pl
from jax.experimental.pallas import tpu as pltpu


def _cheb_kernel(xT_ref, adjT_ref, wT_ref, out_ref,
                 tx_even_ref, tx_odd_ref, acc_ref, *, nj):
    """One grid step (k, j) of the Chebyshev recurrence, transposed layout.

      xT_ref     : (Cin,  TN)      bf16  column slab j of x^T   (only used k==0)
      adjT_ref   : (N,    TN)      bf16  column slab j of adj^T (used k>=1)
      wT_ref     : (Cout, Cin)     bf16  W[k]^T
      out_ref    : (Cout, TN)      f32   column slab j of out^T (written k==K-1)
      tx_even/odd: (NJ, Cin, TN)   bf16  ping-pong slabs of Tx_k^T (Tx_k in k%2)
      acc_ref    : (NJ, Cout, TN)  f32   out^T accumulator slabs
    """
    k = pl.program_id(0)
    K = pl.num_programs(0)
    j = pl.program_id(1)
    cin, tn = xT_ref.shape

    wT = wT_ref[...]                                   # (Cout, Cin) bf16

    def accumulate_and_emit(tx_slab_bf16):
        # tx_slab_bf16: (Cin, TN) bf16 slab of Tx_k^T
        contrib = jnp.dot(wT, tx_slab_bf16,
                          preferred_element_type=jnp.float32)   # (Cout, TN) f32

        @pl.when(k == 0)
        def _():
            acc_ref[j] = contrib                       # init accumulator slab

        @pl.when(k > 0)
        def _():
            acc_ref[j] = acc_ref[j] + contrib

        @pl.when(k == K - 1)
        def _():
            out_ref[...] = acc_ref[j]                  # emit final slab

    def adj_matmul(tx_prev_ref):
        # (Tx_{k-1}^T @ adj^T)[:, slab j]
        #   = sum_i  Tx_{k-1}^T[:, slab i] @ adj^T[rows of slab i, slab j]
        t = jnp.zeros((cin, tn), jnp.float32)
        for i in range(nj):                            # static unroll (small NJ)
            t = t + jnp.dot(tx_prev_ref[i],
                            adjT_ref[i * tn:(i + 1) * tn, :],
                            preferred_element_type=jnp.float32)
        return t

    # ---- k == 0 : Tx_0 = x ---------------------------------------------------
    @pl.when(k == 0)
    def _():
        x_slab = xT_ref[...]                           # (Cin, TN) bf16
        tx_even_ref[j] = x_slab
        accumulate_and_emit(x_slab)

    # ---- k == 1 : Tx_1 = adj @ x ---------------------------------------------
    @pl.when(k == 1)
    def _():
        t = adj_matmul(tx_even_ref)                    # (Cin, TN) f32
        tb = t.astype(jnp.bfloat16)
        tx_odd_ref[j] = tb
        accumulate_and_emit(tb)

    # ---- k >= 2 : Tx_k = 2 * adj @ Tx_{k-1} - Tx_{k-2} -------------------------
    def cheb_step(tprev_ref, tdest_ref):
        t = 2.0 * adj_matmul(tprev_ref) - tdest_ref[j].astype(jnp.float32)
        tb = t.astype(jnp.bfloat16)
        tdest_ref[j] = tb                              # overwrite Tx_{k-2} slab
        accumulate_and_emit(tb)

    @pl.when(jnp.logical_and(k >= 2, k % 2 == 0))
    def _():
        cheb_step(tx_odd_ref, tx_even_ref)             # even k -> even buffer

    @pl.when(jnp.logical_and(k >= 2, k % 2 == 1))
    def _():
        cheb_step(tx_even_ref, tx_odd_ref)             # odd k  -> odd buffer


def _pick_tile(n):
    """Column-slab width TN: a multiple of 128 dividing N when possible."""
    for cand in (512, 256, 128):
        if n % cand == 0:
            return cand
    return n                                           # small graphs: one slab


@jax.jit
def cheb_conv(x, adj, weight, bias=None):
    """ChebConv forward.  x: (N, Cin), adj: (N, N), weight: (K, Cin, Cout)."""
    N, Cin = x.shape
    K, _, Cout = weight.shape

    TN = _pick_tile(N)
    NJ = N // TN

    # Transposed bf16 operands for the MXU: the lane dimension becomes N.
    xT = x.T.astype(jnp.bfloat16)                                 # (Cin, N)
    adjT = adj.T.astype(jnp.bfloat16)                             # (N, N)
    wT = jnp.transpose(weight, (0, 2, 1)).astype(jnp.bfloat16)    # (K, Cout, Cin)

    flops = 2 * (K - 1) * N * N * Cin + 2 * K * N * Cin * Cout
    bytes_accessed = (max(K - 1, 1) * N * N * 2 + Cin * N * 2
                      + K * Cin * Cout * 2 + Cout * N * 4)

    grid_spec = pltpu.PrefetchScalarGridSpec(
        num_scalar_prefetch=0,
        grid=(K, NJ),                                  # k outer (sequential), j inner
        in_specs=[
            # x^T column slab: streamed while k == 0, parked on slab 0 afterwards.
            pl.BlockSpec((Cin, TN), lambda k, j: (0, jnp.where(k == 0, j, 0))),
            # adj^T column slab: streamed for k >= 1, parked on slab 0 at k == 0.
            pl.BlockSpec((N, TN), lambda k, j: (0, jnp.where(k == 0, 0, j))),
            # W[k]^T  (K dim squeezed out)
            pl.BlockSpec((None, Cout, Cin), lambda k, j: (k, 0, 0)),
        ],
        out_specs=pl.BlockSpec((Cout, TN), lambda k, j: (0, j)),
        scratch_shapes=[
            pltpu.VMEM((NJ, Cin, TN), jnp.bfloat16),   # Tx even buffer (Tx_0, Tx_2, ...)
            pltpu.VMEM((NJ, Cin, TN), jnp.bfloat16),   # Tx odd buffer  (Tx_1, Tx_3, ...)
            pltpu.VMEM((NJ, Cout, TN), jnp.float32),   # out^T accumulator
        ],
    )

    outT = pl.pallas_call(
        functools.partial(_cheb_kernel, nj=NJ),
        out_shape=jax.ShapeDtypeStruct((Cout, N), jnp.float32),
        grid_spec=grid_spec,
        compiler_params=pltpu.CompilerParams(
            # k carries the Chebyshev recurrence and j iterations at step k
            # feed every j iteration at step k+1 via VMEM scratch -> both axes
            # must stay on one core, sequential.
            dimension_semantics=("arbitrary", "arbitrary"),
            # Raise the scoped-VMEM ceiling (v5e 16 MiB / v6e 32 MiB defaults)
            # while staying under v7x's 64 MiB physical VMEM.
            vmem_limit_bytes=48 * 1024 * 1024,
        ),
        cost_estimate=pl.CostEstimate(
            flops=flops, transcendentals=0, bytes_accessed=bytes_accessed),
    )(xT, adjT, wT)

    out = outT.T.astype(x.dtype)                       # (N, Cout)
    if bias is not None:
        out = out + bias
    return out


def cheb_conv_ref(x, adj, weight, bias):
    K = weight.shape[0]
    tx0 = x
    out = tx0 @ weight[0]
    tx1 = None
    if K > 1:
        tx1 = adj @ x
        out = out + tx1 @ weight[1]
    for k in range(2, K):
        tx2 = 2.0 * (adj @ tx1) - tx0
        out = out + tx2 @ weight[k]
        tx0, tx1 = tx1, tx2
    return out + bias


if __name__ == "__main__":
    # Small deterministic problem: 384 nodes (3 column slabs of 128),
    # 32 in-features, 32 out-features, K=3.
    N, C_IN, C_OUT, K = 384, 32, 32, 3

    key = jax.random.PRNGKey(0)
    kx, kadj, kw, kb = jax.random.split(key, 4)

    x = jax.random.normal(kx, (N, C_IN), dtype=jnp.float32)
    # Normalized-adjacency surrogate (bounded spectrum).
    adj = jax.random.normal(kadj, (N, N), dtype=jnp.float32) / math.sqrt(N)

    # Parameter init matching reset_parameters(): uniform(-bound, bound),
    # bound = 1 / sqrt(in_channels * K)
    bound = 1.0 / math.sqrt(C_IN * K)
    weight = jax.random.uniform(kw, (K, C_IN, C_OUT), dtype=jnp.float32,
                                minval=-bound, maxval=bound)
    bias = jax.random.uniform(kb, (C_OUT,), dtype=jnp.float32,
                              minval=-bound, maxval=bound)

    out = jax.block_until_ready(cheb_conv(x, adj, weight, bias))
    ref = jax.block_until_ready(cheb_conv_ref(x, adj, weight, bias))

    assert out.shape == (N, C_OUT)
    # bf16 MXU operands => compare with a bf16-appropriate tolerance.
    rel_err = float(jnp.max(jnp.abs(out - ref)) / (jnp.max(jnp.abs(ref)) + 1e-6))
    assert rel_err < 3e-2, f"mismatch vs reference: rel err {rel_err}"
    print("KERNEL_OK")
</pallas_src>

<mosaic_0001>
module attributes {stable_mosaic.version = 11 : i64} {
  func.func @_cheb_kernel(%arg0: i32, %arg1: i32, %arg2: memref<32x128xbf16, #tpu.memory_space<vmem>>, %arg3: memref<384x128xbf16, #tpu.memory_space<vmem>>, %arg4: memref<1x32x32xbf16, #tpu.memory_space<vmem>>, %arg5: memref<32x128xf32, #tpu.memory_space<vmem>>, %arg6: memref<3x32x128xbf16, #tpu.memory_space<vmem>>, %arg7: memref<3x32x128xbf16, #tpu.memory_space<vmem>>, %arg8: memref<3x32x128xf32, #tpu.memory_space<vmem>>) attributes {dimension_semantics = [#tpu.dimension_semantics<arbitrary>, #tpu.dimension_semantics<arbitrary>], iteration_bounds = array<i64: 3, 3>, scalar_prefetch = 0 : i64, scratch_operands = 3 : i64, tpu.core_type = #tpu.core_type<tc>, window_params = [{transform_indices = @transform_0, window_bounds = array<i64: 32, 128>}, {transform_indices = @transform_1, window_bounds = array<i64: 384, 128>}, {transform_indices = @transform_2, window_bounds = array<i64: 1, 32, 32>}, {transform_indices = @transform_3, window_bounds = array<i64: 32, 128>}]} {
    %c0 = arith.constant 0 : index
    %c0_0 = arith.constant 0 : index
    %c0_1 = arith.constant 0 : index
    %0 = vector.load %arg4[%c0, %c0_0, %c0_1] : memref<1x32x32xbf16, #tpu.memory_space<vmem>>, vector<1x32x32xbf16>
    %1 = vector.shape_cast %0 : vector<1x32x32xbf16> to vector<32x32xbf16>
    %c0_i32 = arith.constant 0 : i32
    %2 = arith.cmpi eq, %arg0, %c0_i32 : i32
    %3 = arith.extui %2 : i1 to i32
    %c0_i32_2 = arith.constant 0 : i32
    %4 = arith.cmpi ne, %3, %c0_i32_2 : i32
    scf.if %4 {
      %c0_21 = arith.constant 0 : index
      %c0_22 = arith.constant 0 : index
      %38 = vector.load %arg2[%c0_21, %c0_22] : memref<32x128xbf16, #tpu.memory_space<vmem>>, vector<32x128xbf16>
      %39 = arith.index_cast %arg1 : i32 to index
      %c0_23 = arith.constant 0 : index
      %c0_24 = arith.constant 0 : index
      %40 = vector.load %arg6[%39, %c0_23, %c0_24] : memref<3x32x128xbf16, #tpu.memory_space<vmem>>, vector<1x32x128xbf16>
      %41 = vector.shape_cast %40 : vector<1x32x128xbf16> to vector<32x128xbf16>
      %42 = vector.shape_cast %38 : vector<32x128xbf16> to vector<1x32x128xbf16>
      tpu.vector_store %arg6[%39, %c0_23, %c0_24], %42 {strides = array<i32>} : memref<3x32x128xbf16, #tpu.memory_space<vmem>>, vector<1x32x128xbf16>,
      %cst = arith.constant dense<0.000000e+00> : vector<32x128xf32>
      %43 = tpu.matmul %1, %38, %cst {dimension_numbers = #tpu.dot_dimension_numbers<[1], [0], [0], [1], [0, 0, 1, 1], [], []>} : vector<32x32xbf16>, vector<32x128xbf16>, vector<32x128xf32> -> vector<32x128xf32>
      %c0_i32_25 = arith.constant 0 : i32
      %44 = arith.cmpi eq, %arg0, %c0_i32_25 : i32
      %45 = arith.extui %44 : i1 to i32
      %c0_i32_26 = arith.constant 0 : i32
      %46 = arith.cmpi ne, %45, %c0_i32_26 : i32
      scf.if %46 {
        %53 = arith.index_cast %arg1 : i32 to index
        %c0_31 = arith.constant 0 : index
        %c0_32 = arith.constant 0 : index
        %54 = vector.load %arg8[%53, %c0_31, %c0_32] : memref<3x32x128xf32, #tpu.memory_space<vmem>>, vector<1x32x128xf32>
        %55 = vector.shape_cast %54 : vector<1x32x128xf32> to vector<32x128xf32>
        %56 = vector.shape_cast %43 : vector<32x128xf32> to vector<1x32x128xf32>
        tpu.vector_store %arg8[%53, %c0_31, %c0_32], %56 {strides = array<i32>} : memref<3x32x128xf32, #tpu.memory_space<vmem>>, vector<1x32x128xf32>,
      } else {
      }
      %c0_i32_27 = arith.constant 0 : i32
      %47 = arith.cmpi sgt, %arg0, %c0_i32_27 : i32
      %48 = arith.extui %47 : i1 to i32
      %c0_i32_28 = arith.constant 0 : i32
      %49 = arith.cmpi ne, %48, %c0_i32_28 : i32
      scf.if %49 {
        %53 = arith.index_cast %arg1 : i32 to index
        %c0_31 = arith.constant 0 : index
        %c0_32 = arith.constant 0 : index
        %54 = vector.load %arg8[%53, %c0_31, %c0_32] : memref<3x32x128xf32, #tpu.memory_space<vmem>>, vector<1x32x128xf32>
        %55 = vector.shape_cast %54 : vector<1x32x128xf32> to vector<32x128xf32>
        %56 = arith.addf %55, %43 : vector<32x128xf32>
        %57 = arith.index_cast %arg1 : i32 to index
        %c0_33 = arith.constant 0 : index
        %c0_34 = arith.constant 0 : index
        %58 = vector.load %arg8[%57, %c0_33, %c0_34] : memref<3x32x128xf32, #tpu.memory_space<vmem>>, vector<1x32x128xf32>
        %59 = vector.shape_cast %58 : vector<1x32x128xf32> to vector<32x128xf32>
        %60 = vector.shape_cast %56 : vector<32x128xf32> to vector<1x32x128xf32>
        tpu.vector_store %arg8[%57, %c0_33, %c0_34], %60 {strides = array<i32>} : memref<3x32x128xf32, #tpu.memory_space<vmem>>, vector<1x32x128xf32>,
      } else {
      }
      %c2_i32_29 = arith.constant 2 : i32
      %50 = arith.cmpi eq, %arg0, %c2_i32_29 : i32
      %51 = arith.extui %50 : i1 to i32
      %c0_i32_30 = arith.constant 0 : i32
      %52 = arith.cmpi ne, %51, %c0_i32_30 : i32
      scf.if %52 {
        %53 = arith.index_cast %arg1 : i32 to index
        %c0_31 = arith.constant 0 : index
        %c0_32 = arith.constant 0 : index
        %54 = vector.load %arg8[%53, %c0_31, %c0_32] : memref<3x32x128xf32, #tpu.memory_space<vmem>>, vector<1x32x128xf32>
        %55 = vector.shape_cast %54 : vector<1x32x128xf32> to vector<32x128xf32>
        %c0_33 = arith.constant 0 : index
        %c0_34 = arith.constant 0 : index
        %56 = vector.load %arg5[%c0_33, %c0_34] : memref<32x128xf32, #tpu.memory_space<vmem>>, vector<32x128xf32>
        tpu.vector_store %arg5[%c0_33, %c0_34], %55 {strides = array<i32>} : memref<32x128xf32, #tpu.memory_space<vmem>>, vector<32x128xf32>,
      } else {
      }
    } else {
    }
    %c1_i32 = arith.constant 1 : i32
    %5 = arith.cmpi eq, %arg0, %c1_i32 : i32
    %6 = arith.extui %5 : i1 to i32
    %c0_i32_3 = arith.constant 0 : i32
    %7 = arith.cmpi ne, %6, %c0_i32_3 : i32
    scf.if %7 {
      %cst = arith.constant 0.000000e+00 : f32
      %38 = vector.broadcast %cst : f32 to vector<32x128xf32>
      %c0_21 = arith.constant 0 : index
      %c0_22 = arith.constant 0 : index
      %c0_23 = arith.constant 0 : index
      %39 = vector.load %arg6[%c0_21, %c0_22, %c0_23] : memref<3x32x128xbf16, #tpu.memory_space<vmem>>, vector<1x32x128xbf16>
      %40 = vector.shape_cast %39 : vector<1x32x128xbf16> to vector<32x128xbf16>
      %c0_24 = arith.constant 0 : index
      %c0_25 = arith.constant 0 : index
      %41 = vector.load %arg3[%c0_24, %c0_25] : memref<384x128xbf16, #tpu.memory_space<vmem>>, vector<128x128xbf16>
      %cst_26 = arith.constant dense<0.000000e+00> : vector<32x128xf32>
      %42 = tpu.matmul %40, %41, %cst_26 {dimension_numbers = #tpu.dot_dimension_numbers<[1], [0], [0], [1], [0, 0, 1, 1], [], []>} : vector<32x128xbf16>, vector<128x128xbf16>, vector<32x128xf32> -> vector<32x128xf32>
      %43 = arith.addf %38, %42 : vector<32x128xf32>
      %c1 = arith.constant 1 : index
      %c0_27 = arith.constant 0 : index
      %c0_28 = arith.constant 0 : index
      %44 = vector.load %arg6[%c1, %c0_27, %c0_28] : memref<3x32x128xbf16, #tpu.memory_space<vmem>>, vector<1x32x128xbf16>
      %45 = vector.shape_cast %44 : vector<1x32x128xbf16> to vector<32x128xbf16>
      %c128 = arith.constant 128 : index
      %c0_29 = arith.constant 0 : index
      %46 = vector.load %arg3[%c128, %c0_29] : memref<384x128xbf16, #tpu.memory_space<vmem>>, vector<128x128xbf16>
      %cst_30 = arith.constant dense<0.000000e+00> : vector<32x128xf32>
      %47 = tpu.matmul %45, %46, %cst_30 {dimension_numbers = #tpu.dot_dimension_numbers<[1], [0], [0], [1], [0, 0, 1, 1], [], []>} : vector<32x128xbf16>, vector<128x128xbf16>, vector<32x128xf32> -> vector<32x128xf32>
      %48 = arith.addf %43, %47 : vector<32x128xf32>
      %c2 = arith.constant 2 : index
      %c0_31 = arith.constant 0 : index
      %c0_32 = arith.constant 0 : index
      %49 = vector.load %arg6[%c2, %c0_31, %c0_32] : memref<3x32x128xbf16, #tpu.memory_space<vmem>>, vector<1x32x128xbf16>
      %50 = vector.shape_cast %49 : vector<1x32x128xbf16> to vector<32x128xbf16>
      %c256 = arith.constant 256 : index
      %c0_33 = arith.constant 0 : index
      %51 = vector.load %arg3[%c256, %c0_33] : memref<384x128xbf16, #tpu.memory_space<vmem>>, vector<128x128xbf16>
      %cst_34 = arith.constant dense<0.000000e+00> : vector<32x128xf32>
      %52 = tpu.matmul %50, %51, %cst_34 {dimension_numbers = #tpu.dot_dimension_numbers<[1], [0], [0], [1], [0, 0, 1, 1], [], []>} : vector<32x128xbf16>, vector<128x128xbf16>, vector<32x128xf32> -> vector<32x128xf32>
      %53 = arith.addf %48, %52 : vector<32x128xf32>
      %54 = arith.truncf %53 : vector<32x128xf32> to vector<32x128xbf16>
      %55 = arith.index_cast %arg1 : i32 to index
      %c0_35 = arith.constant 0 : index
      %c0_36 = arith.constant 0 : index
      %56 = vector.load %arg7[%55, %c0_35, %c0_36] : memref<3x32x128xbf16, #tpu.memory_space<vmem>>, vector<1x32x128xbf16>
      %57 = vector.shape_cast %56 : vector<1x32x128xbf16> to vector<32x128xbf16>
      %58 = vector.shape_cast %54 : vector<32x128xbf16> to vector<1x32x128xbf16>
      tpu.vector_store %arg7[%55, %c0_35, %c0_36], %58 {strides = array<i32>} : memref<3x32x128xbf16, #tpu.memory_space<vmem>>, vector<1x32x128xbf16>,
      %cst_37 = arith.constant dense<0.000000e+00> : vector<32x128xf32>
      %59 = tpu.matmul %1, %54, %cst_37 {dimension_numbers = #tpu.dot_dimension_numbers<[1], [0], [0], [1], [0, 0, 1, 1], [], []>} : vector<32x32xbf16>, vector<32x128xbf16>, vector<32x128xf32> -> vector<32x128xf32>
      %c0_i32_38 = arith.constant 0 : i32
      %60 = arith.cmpi eq, %arg0, %c0_i32_38 : i32
      %61 = arith.extui %60 : i1 to i32
      %c0_i32_39 = arith.constant 0 : i32
      %62 = arith.cmpi ne, %61, %c0_i32_39 : i32
      scf.if %62 {
        %69 = arith.index_cast %arg1 : i32 to index
        %c0_44 = arith.constant 0 : index
        %c0_45 = arith.constant 0 : index
        %70 = vector.load %arg8[%69, %c0_44, %c0_45] : memref<3x32x128xf32, #tpu.memory_space<vmem>>, vector<1x32x128xf32>
        %71 = vector.shape_cast %70 : vector<1x32x128xf32> to vector<32x128xf32>
        %72 = vector.shape_cast %59 : vector<32x128xf32> to vector<1x32x128xf32>
        tpu.vector_store %arg8[%69, %c0_44, %c0_45], %72 {strides = array<i32>} : memref<3x32x128xf32, #tpu.memory_space<vmem>>, vector<1x32x128xf32>,
      } else {
      }
      %c0_i32_40 = arith.constant 0 : i32
      %63 = arith.cmpi sgt, %arg0, %c0_i32_40 : i32
      %64 = arith.extui %63 : i1 to i32
      %c0_i32_41 = arith.constant 0 : i32
      %65 = arith.cmpi ne, %64, %c0_i32_41 : i32
      scf.if %65 {
        %69 = arith.index_cast %arg1 : i32 to index
        %c0_44 = arith.constant 0 : index
        %c0_45 = arith.constant 0 : index
        %70 = vector.load %arg8[%69, %c0_44, %c0_45] : memref<3x32x128xf32, #tpu.memory_space<vmem>>, vector<1x32x128xf32>
        %71 = vector.shape_cast %70 : vector<1x32x128xf32> to vector<32x128xf32>
        %72 = arith.addf %71, %59 : vector<32x128xf32>
        %73 = arith.index_cast %arg1 : i32 to index
        %c0_46 = arith.constant 0 : index
        %c0_47 = arith.constant 0 : index
        %74 = vector.load %arg8[%73, %c0_46, %c0_47] : memref<3x32x128xf32, #tpu.memory_space<vmem>>, vector<1x32x128xf32>
        %75 = vector.shape_cast %74 : vector<1x32x128xf32> to vector<32x128xf32>
        %76 = vector.shape_cast %72 : vector<32x128xf32> to vector<1x32x128xf32>
        tpu.vector_store %arg8[%73, %c0_46, %c0_47], %76 {strides = array<i32>} : memref<3x32x128xf32, #tpu.memory_space<vmem>>, vector<1x32x128xf32>,
      } else {
      }
      %c2_i32_42 = arith.constant 2 : i32
      %66 = arith.cmpi eq, %arg0, %c2_i32_42 : i32
      %67 = arith.extui %66 : i1 to i32
      %c0_i32_43 = arith.constant 0 : i32
      %68 = arith.cmpi ne, %67, %c0_i32_43 : i32
      scf.if %68 {
        %69 = arith.index_cast %arg1 : i32 to index
        %c0_44 = arith.constant 0 : index
        %c0_45 = arith.constant 0 : index
        %70 = vector.load %arg8[%69, %c0_44, %c0_45] : memref<3x32x128xf32, #tpu.memory_space<vmem>>, vector<1x32x128xf32>
        %71 = vector.shape_cast %70 : vector<1x32x128xf32> to vector<32x128xf32>
        %c0_46 = arith.constant 0 : index
        %c0_47 = arith.constant 0 : index
        %72 = vector.load %arg5[%c0_46, %c0_47] : memref<32x128xf32, #tpu.memory_space<vmem>>, vector<32x128xf32>
        tpu.vector_store %arg5[%c0_46, %c0_47], %71 {strides = array<i32>} : memref<32x128xf32, #tpu.memory_space<vmem>>, vector<32x128xf32>,
      } else {
      }
    } else {
    }
    %c2_i32 = arith.constant 2 : i32
    %8 = arith.cmpi sge, %arg0, %c2_i32 : i32
    %c2_i32_4 = arith.constant 2 : i32
    %c0_i32_5 = arith.constant 0 : i32
    %9 = arith.cmpi eq, %c2_i32_4, %c0_i32_5 : i32
    %c1_i32_6 = arith.constant 1 : i32
    %10 = arith.select %9, %c1_i32_6, %c2_i32_4 : i32
    %11 = arith.remsi %arg0, %10 : i32
    %c0_i32_7 = arith.constant 0 : i32
    %12 = arith.cmpi ne, %11, %c0_i32_7 : i32
    %c0_i32_8 = arith.constant 0 : i32
    %13 = arith.cmpi slt, %11, %c0_i32_8 : i32
    %c0_i32_9 = arith.constant 0 : i32
    %14 = arith.cmpi slt, %10, %c0_i32_9 : i32
    %15 = arith.xori %13, %14 : i1
    %16 = arith.andi %15, %12 : i1
    %17 = arith.addi %11, %10 : i32
    %18 = arith.select %16, %17, %11 : i32
    %c0_i32_10 = arith.constant 0 : i32
    %19 = arith.cmpi eq, %18, %c0_i32_10 : i32
    %20 = arith.andi %8, %19 : i1
    %21 = arith.extui %20 : i1 to i32
    %c0_i32_11 = arith.constant 0 : i32
    %22 = arith.cmpi ne, %21, %c0_i32_11 : i32
    scf.if %22 {
      %cst = arith.constant 0.000000e+00 : f32
      %38 = vector.broadcast %cst : f32 to vector<32x128xf32>
      %c0_21 = arith.constant 0 : index
      %c0_22 = arith.constant 0 : index
      %c0_23 = arith.constant 0 : index
      %39 = vector.load %arg7[%c0_21, %c0_22, %c0_23] : memref<3x32x128xbf16, #tpu.memory_space<vmem>>, vector<1x32x128xbf16>
      %40 = vector.shape_cast %39 : vector<1x32x128xbf16> to vector<32x128xbf16>
      %c0_24 = arith.constant 0 : index
      %c0_25 = arith.constant 0 : index
      %41 = vector.load %arg3[%c0_24, %c0_25] : memref<384x128xbf16, #tpu.memory_space<vmem>>, vector<128x128xbf16>
      %cst_26 = arith.constant dense<0.000000e+00> : vector<32x128xf32>
      %42 = tpu.matmul %40, %41, %cst_26 {dimension_numbers = #tpu.dot_dimension_numbers<[1], [0], [0], [1], [0, 0, 1, 1], [], []>} : vector<32x128xbf16>, vector<128x128xbf16>, vector<32x128xf32> -> vector<32x128xf32>
      %43 = arith.addf %38, %42 : vector<32x128xf32>
      %c1 = arith.constant 1 : index
      %c0_27 = arith.constant 0 : index
      %c0_28 = arith.constant 0 : index
      %44 = vector.load %arg7[%c1, %c0_27, %c0_28] : memref<3x32x128xbf16, #tpu.memory_space<vmem>>, vector<1x32x128xbf16>
      %45 = vector.shape_cast %44 : vector<1x32x128xbf16> to vector<32x128xbf16>
      %c128 = arith.constant 128 : index
      %c0_29 = arith.constant 0 : index
      %46 = vector.load %arg3[%c128, %c0_29] : memref<384x128xbf16, #tpu.memory_space<vmem>>, vector<128x128xbf16>
      %cst_30 = arith.constant dense<0.000000e+00> : vector<32x128xf32>
      %47 = tpu.matmul %45, %46, %cst_30 {dimension_numbers = #tpu.dot_dimension_numbers<[1], [0], [0], [1], [0, 0, 1, 1], [], []>} : vector<32x128xbf16>, vector<128x128xbf16>, vector<32x128xf32> -> vector<32x128xf32>
      %48 = arith.addf %43, %47 : vector<32x128xf32>
      %c2 = arith.constant 2 : index
      %c0_31 = arith.constant 0 : index
      %c0_32 = arith.constant 0 : index
      %49 = vector.load %arg7[%c2, %c0_31, %c0_32] : memref<3x32x128xbf16, #tpu.memory_space<vmem>>, vector<1x32x128xbf16>
      %50 = vector.shape_cast %49 : vector<1x32x128xbf16> to vector<32x128xbf16>
      %c256 = arith.constant 256 : index
      %c0_33 = arith.constant 0 : index
      %51 = vector.load %arg3[%c256, %c0_33] : memref<384x128xbf16, #tpu.memory_space<vmem>>, vector<128x128xbf16>
      %cst_34 = arith.constant dense<0.000000e+00> : vector<32x128xf32>
      %52 = tpu.matmul %50, %51, %cst_34 {dimension_numbers = #tpu.dot_dimension_numbers<[1], [0], [0], [1], [0, 0, 1, 1], [], []>} : vector<32x128xbf16>, vector<128x128xbf16>, vector<32x128xf32> -> vector<32x128xf32>
      %53 = arith.addf %48, %52 : vector<32x128xf32>
      %cst_35 = arith.constant 2.000000e+00 : f32
      %54 = vector.broadcast %cst_35 : f32 to vector<32x128xf32>
      %55 = arith.mulf %54, %53 : vector<32x128xf32>
      %56 = arith.index_cast %arg1 : i32 to index
      %c0_36 = arith.constant 0 : index
      %c0_37 = arith.constant 0 : index
      %57 = vector.load %arg6[%56, %c0_36, %c0_37] : memref<3x32x128xbf16, #tpu.memory_space<vmem>>, vector<1x32x128xbf16>
      %58 = vector.shape_cast %57 : vector<1x32x128xbf16> to vector<32x128xbf16>
      %59 = arith.extf %58 : vector<32x128xbf16> to vector<32x128xf32>
      %60 = arith.subf %55, %59 : vector<32x128xf32>
      %61 = arith.truncf %60 : vector<32x128xf32> to vector<32x128xbf16>
      %62 = arith.index_cast %arg1 : i32 to index
      %c0_38 = arith.constant 0 : index
      %c0_39 = arith.constant 0 : index
      %63 = vector.load %arg6[%62, %c0_38, %c0_39] : memref<3x32x128xbf16, #tpu.memory_space<vmem>>, vector<1x32x128xbf16>
      %64 = vector.shape_cast %63 : vector<1x32x128xbf16> to vector<32x128xbf16>
      %65 = vector.shape_cast %61 : vector<32x128xbf16> to vector<1x32x128xbf16>
      tpu.vector_store %arg6[%62, %c0_38, %c0_39], %65 {strides = array<i32>} : memref<3x32x128xbf16, #tpu.memory_space<vmem>>, vector<1x32x128xbf16>,
      %cst_40 = arith.constant dense<0.000000e+00> : vector<32x128xf32>
      %66 = tpu.matmul %1, %61, %cst_40 {dimension_numbers = #tpu.dot_dimension_numbers<[1], [0], [0], [1], [0, 0, 1, 1], [], []>} : vector<32x32xbf16>, vector<32x128xbf16>, vector<32x128xf32> -> vector<32x128xf32>
      %c0_i32_41 = arith.constant 0 : i32
      %67 = arith.cmpi eq, %arg0, %c0_i32_41 : i32
      %68 = arith.extui %67 : i1 to i32
      %c0_i32_42 = arith.constant 0 : i32
      %69 = arith.cmpi ne, %68, %c0_i32_42 : i32
      scf.if %69 {
        %76 = arith.index_cast %arg1 : i32 to index
        %c0_47 = arith.constant 0 : index
        %c0_48 = arith.constant 0 : index
        %77 = vector.load %arg8[%76, %c0_47, %c0_48] : memref<3x32x128xf32, #tpu.memory_space<vmem>>, vector<1x32x128xf32>
        %78 = vector.shape_cast %77 : vector<1x32x128xf32> to vector<32x128xf32>
        %79 = vector.shape_cast %66 : vector<32x128xf32> to vector<1x32x128xf32>
        tpu.vector_store %arg8[%76, %c0_47, %c0_48], %79 {strides = array<i32>} : memref<3x32x128xf32, #tpu.memory_space<vmem>>, vector<1x32x128xf32>,
      } else {
      }
      %c0_i32_43 = arith.constant 0 : i32
      %70 = arith.cmpi sgt, %arg0, %c0_i32_43 : i32
      %71 = arith.extui %70 : i1 to i32
      %c0_i32_44 = arith.constant 0 : i32
      %72 = arith.cmpi ne, %71, %c0_i32_44 : i32
      scf.if %72 {
        %76 = arith.index_cast %arg1 : i32 to index
        %c0_47 = arith.constant 0 : index
        %c0_48 = arith.constant 0 : index
        %77 = vector.load %arg8[%76, %c0_47, %c0_48] : memref<3x32x128xf32, #tpu.memory_space<vmem>>, vector<1x32x128xf32>
        %78 = vector.shape_cast %77 : vector<1x32x128xf32> to vector<32x128xf32>
        %79 = arith.addf %78, %66 : vector<32x128xf32>
        %80 = arith.index_cast %arg1 : i32 to index
        %c0_49 = arith.constant 0 : index
        %c0_50 = arith.constant 0 : index
        %81 = vector.load %arg8[%80, %c0_49, %c0_50] : memref<3x32x128xf32, #tpu.memory_space<vmem>>, vector<1x32x128xf32>
        %82 = vector.shape_cast %81 : vector<1x32x128xf32> to vector<32x128xf32>
        %83 = vector.shape_cast %79 : vector<32x128xf32> to vector<1x32x128xf32>
        tpu.vector_store %arg8[%80, %c0_49, %c0_50], %83 {strides = array<i32>} : memref<3x32x128xf32, #tpu.memory_space<vmem>>, vector<1x32x128xf32>,
      } else {
      }
      %c2_i32_45 = arith.constant 2 : i32
      %73 = arith.cmpi eq, %arg0, %c2_i32_45 : i32
      %74 = arith.extui %73 : i1 to i32
      %c0_i32_46 = arith.constant 0 : i32
      %75 = arith.cmpi ne, %74, %c0_i32_46 : i32
      scf.if %75 {
        %76 = arith.index_cast %arg1 : i32 to index
        %c0_47 = arith.constant 0 : index
        %c0_48 = arith.constant 0 : index
        %77 = vector.load %arg8[%76, %c0_47, %c0_48] : memref<3x32x128xf32, #tpu.memory_space<vmem>>, vector<1x32x128xf32>
        %78 = vector.shape_cast %77 : vector<1x32x128xf32> to vector<32x128xf32>
        %c0_49 = arith.constant 0 : index
        %c0_50 = arith.constant 0 : index
        %79 = vector.load %arg5[%c0_49, %c0_50] : memref<32x128xf32, #tpu.memory_space<vmem>>, vector<32x128xf32>
        tpu.vector_store %arg5[%c0_49, %c0_50], %78 {strides = array<i32>} : memref<32x128xf32, #tpu.memory_space<vmem>>, vector<32x128xf32>,
      } else {
      }
    } else {
    }
    %c2_i32_12 = arith.constant 2 : i32
    %23 = arith.cmpi sge, %arg0, %c2_i32_12 : i32
    %c2_i32_13 = arith.constant 2 : i32
    %c0_i32_14 = arith.constant 0 : i32
    %24 = arith.cmpi eq, %c2_i32_13, %c0_i32_14 : i32
    %c1_i32_15 = arith.constant 1 : i32
    %25 = arith.select %24, %c1_i32_15, %c2_i32_13 : i32
    %26 = arith.remsi %arg0, %25 : i32
    %c0_i32_16 = arith.constant 0 : i32
    %27 = arith.cmpi ne, %26, %c0_i32_16 : i32
    %c0_i32_17 = arith.constant 0 : i32
    %28 = arith.cmpi slt, %26, %c0_i32_17 : i32
    %c0_i32_18 = arith.constant 0 : i32
    %29 = arith.cmpi slt, %25, %c0_i32_18 : i32
    %30 = arith.xori %28, %29 : i1
    %31 = arith.andi %30, %27 : i1
    %32 = arith.addi %26, %25 : i32
    %33 = arith.select %31, %32, %26 : i32
    %c1_i32_19 = arith.constant 1 : i32
    %34 = arith.cmpi eq, %33, %c1_i32_19 : i32
    %35 = arith.andi %23, %34 : i1
    %36 = arith.extui %35 : i1 to i32
    %c0_i32_20 = arith.constant 0 : i32
    %37 = arith.cmpi ne, %36, %c0_i32_20 : i32
    scf.if %37 {
      %cst = arith.constant 0.000000e+00 : f32
      %38 = vector.broadcast %cst : f32 to vector<32x128xf32>
      %c0_21 = arith.constant 0 : index
      %c0_22 = arith.constant 0 : index
      %c0_23 = arith.constant 0 : index
      %39 = vector.load %arg6[%c0_21, %c0_22, %c0_23] : memref<3x32x128xbf16, #tpu.memory_space<vmem>>, vector<1x32x128xbf16>
      %40 = vector.shape_cast %39 : vector<1x32x128xbf16> to vector<32x128xbf16>
      %c0_24 = arith.constant 0 : index
      %c0_25 = arith.constant 0 : index
      %41 = vector.load %arg3[%c0_24, %c0_25] : memref<384x128xbf16, #tpu.memory_space<vmem>>, vector<128x128xbf16>
      %cst_26 = arith.constant dense<0.000000e+00> : vector<32x128xf32>
      %42 = tpu.matmul %40, %41, %cst_26 {dimension_numbers = #tpu.dot_dimension_numbers<[1], [0], [0], [1], [0, 0, 1, 1], [], []>} : vector<32x128xbf16>, vector<128x128xbf16>, vector<32x128xf32> -> vector<32x128xf32>
      %43 = arith.addf %38, %42 : vector<32x128xf32>
      %c1 = arith.constant 1 : index
      %c0_27 = arith.constant 0 : index
      %c0_28 = arith.constant 0 : index
      %44 = vector.load %arg6[%c1, %c0_27, %c0_28] : memref<3x32x128xbf16, #tpu.memory_space<vmem>>, vector<1x32x128xbf16>
      %45 = vector.shape_cast %44 : vector<1x32x128xbf16> to vector<32x128xbf16>
      %c128 = arith.constant 128 : index
      %c0_29 = arith.constant 0 : index
      %46 = vector.load %arg3[%c128, %c0_29] : memref<384x128xbf16, #tpu.memory_space<vmem>>, vector<128x128xbf16>
      %cst_30 = arith.constant dense<0.000000e+00> : vector<32x128xf32>
      %47 = tpu.matmul %45, %46, %cst_30 {dimension_numbers = #tpu.dot_dimension_numbers<[1], [0], [0], [1], [0, 0, 1, 1], [], []>} : vector<32x128xbf16>, vector<128x128xbf16>, vector<32x128xf32> -> vector<32x128xf32>
      %48 = arith.addf %43, %47 : vector<32x128xf32>
      %c2 = arith.constant 2 : index
      %c0_31 = arith.constant 0 : index
      %c0_32 = arith.constant 0 : index
      %49 = vector.load %arg6[%c2, %c0_31, %c0_32] : memref<3x32x128xbf16, #tpu.memory_space<vmem>>, vector<1x32x128xbf16>
      %50 = vector.shape_cast %49 : vector<1x32x128xbf16> to vector<32x128xbf16>
      %c256 = arith.constant 256 : index
      %c0_33 = arith.constant 0 : index
      %51 = vector.load %arg3[%c256, %c0_33] : memref<384x128xbf16, #tpu.memory_space<vmem>>, vector<128x128xbf16>
      %cst_34 = arith.constant dense<0.000000e+00> : vector<32x128xf32>
      %52 = tpu.matmul %50, %51, %cst_34 {dimension_numbers = #tpu.dot_dimension_numbers<[1], [0], [0], [1], [0, 0, 1, 1], [], []>} : vector<32x128xbf16>, vector<128x128xbf16>, vector<32x128xf32> -> vector<32x128xf32>
      %53 = arith.addf %48, %52 : vector<32x128xf32>
      %cst_35 = arith.constant 2.000000e+00 : f32
      %54 = vector.broadcast %cst_35 : f32 to vector<32x128xf32>
      %55 = arith.mulf %54, %53 : vector<32x128xf32>
      %56 = arith.index_cast %arg1 : i32 to index
      %c0_36 = arith.constant 0 : index
      %c0_37 = arith.constant 0 : index
      %57 = vector.load %arg7[%56, %c0_36, %c0_37] : memref<3x32x128xbf16, #tpu.memory_space<vmem>>, vector<1x32x128xbf16>
      %58 = vector.shape_cast %57 : vector<1x32x128xbf16> to vector<32x128xbf16>
      %59 = arith.extf %58 : vector<32x128xbf16> to vector<32x128xf32>
      %60 = arith.subf %55, %59 : vector<32x128xf32>
      %61 = arith.truncf %60 : vector<32x128xf32> to vector<32x128xbf16>
      %62 = arith.index_cast %arg1 : i32 to index
      %c0_38 = arith.constant 0 : index
      %c0_39 = arith.constant 0 : index
      %63 = vector.load %arg7[%62, %c0_38, %c0_39] : memref<3x32x128xbf16, #tpu.memory_space<vmem>>, vector<1x32x128xbf16>
      %64 = vector.shape_cast %63 : vector<1x32x128xbf16> to vector<32x128xbf16>
      %65 = vector.shape_cast %61 : vector<32x128xbf16> to vector<1x32x128xbf16>
      tpu.vector_store %arg7[%62, %c0_38, %c0_39], %65 {strides = array<i32>} : memref<3x32x128xbf16, #tpu.memory_space<vmem>>, vector<1x32x128xbf16>,
      %cst_40 = arith.constant dense<0.000000e+00> : vector<32x128xf32>
      %66 = tpu.matmul %1, %61, %cst_40 {dimension_numbers = #tpu.dot_dimension_numbers<[1], [0], [0], [1], [0, 0, 1, 1], [], []>} : vector<32x32xbf16>, vector<32x128xbf16>, vector<32x128xf32> -> vector<32x128xf32>
      %c0_i32_41 = arith.constant 0 : i32
      %67 = arith.cmpi eq, %arg0, %c0_i32_41 : i32
      %68 = arith.extui %67 : i1 to i32
      %c0_i32_42 = arith.constant 0 : i32
      %69 = arith.cmpi ne, %68, %c0_i32_42 : i32
      scf.if %69 {
        %76 = arith.index_cast %arg1 : i32 to index
        %c0_47 = arith.constant 0 : index
        %c0_48 = arith.constant 0 : index
        %77 = vector.load %arg8[%76, %c0_47, %c0_48] : memref<3x32x128xf32, #tpu.memory_space<vmem>>, vector<1x32x128xf32>
        %78 = vector.shape_cast %77 : vector<1x32x128xf32> to vector<32x128xf32>
        %79 = vector.shape_cast %66 : vector<32x128xf32> to vector<1x32x128xf32>
        tpu.vector_store %arg8[%76, %c0_47, %c0_48], %79 {strides = array<i32>} : memref<3x32x128xf32, #tpu.memory_space<vmem>>, vector<1x32x128xf32>,
      } else {
      }
      %c0_i32_43 = arith.constant 0 : i32
      %70 = arith.cmpi sgt, %arg0, %c0_i32_43 : i32
      %71 = arith.extui %70 : i1 to i32
      %c0_i32_44 = arith.constant 0 : i32
      %72 = arith.cmpi ne, %71, %c0_i32_44 : i32
      scf.if %72 {
        %76 = arith.index_cast %arg1 : i32 to index
        %c0_47 = arith.constant 0 : index
        %c0_48 = arith.constant 0 : index
        %77 = vector.load %arg8[%76, %c0_47, %c0_48] : memref<3x32x128xf32, #tpu.memory_space<vmem>>, vector<1x32x128xf32>
        %78 = vector.shape_cast %77 : vector<1x32x128xf32> to vector<32x128xf32>
        %79 = arith.addf %78, %66 : vector<32x128xf32>
        %80 = arith.index_cast %arg1 : i32 to index
        %c0_49 = arith.constant 0 : index
        %c0_50 = arith.constant 0 : index
        %81 = vector.load %arg8[%80, %c0_49, %c0_50] : memref<3x32x128xf32, #tpu.memory_space<vmem>>, vector<1x32x128xf32>
        %82 = vector.shape_cast %81 : vector<1x32x128xf32> to vector<32x128xf32>
        %83 = vector.shape_cast %79 : vector<32x128xf32> to vector<1x32x128xf32>
        tpu.vector_store %arg8[%80, %c0_49, %c0_50], %83 {strides = array<i32>} : memref<3x32x128xf32, #tpu.memory_space<vmem>>, vector<1x32x128xf32>,
      } else {
      }
      %c2_i32_45 = arith.constant 2 : i32
      %73 = arith.cmpi eq, %arg0, %c2_i32_45 : i32
      %74 = arith.extui %73 : i1 to i32
      %c0_i32_46 = arith.constant 0 : i32
      %75 = arith.cmpi ne, %74, %c0_i32_46 : i32
      scf.if %75 {
        %76 = arith.index_cast %arg1 : i32 to index
        %c0_47 = arith.constant 0 : index
        %c0_48 = arith.constant 0 : index
        %77 = vector.load %arg8[%76, %c0_47, %c0_48] : memref<3x32x128xf32, #tpu.memory_space<vmem>>, vector<1x32x128xf32>
        %78 = vector.shape_cast %77 : vector<1x32x128xf32> to vector<32x128xf32>
        %c0_49 = arith.constant 0 : index
        %c0_50 = arith.constant 0 : index
        %79 = vector.load %arg5[%c0_49, %c0_50] : memref<32x128xf32, #tpu.memory_space<vmem>>, vector<32x128xf32>
        tpu.vector_store %arg5[%c0_49, %c0_50], %78 {strides = array<i32>} : memref<32x128xf32, #tpu.memory_space<vmem>>, vector<32x128xf32>,
      } else {
      }
    } else {
    }
    return
  }
  func.func @transform_0(%arg0: i32, %arg1: i32) -> (i32, i32) {
    %c0_i32 = arith.constant 0 : i32
    %0 = arith.cmpi eq, %arg0, %c0_i32 : i32
    %c0_i32_0 = arith.constant 0 : i32
    %1 = arith.select %0, %arg1, %c0_i32_0 : i32
    %c0_i32_1 = arith.constant 0 : i32
    %c0_i32_2 = arith.constant 0 : i32
    return %c0_i32_1, %1 : i32, i32
  }
  func.func @transform_1(%arg0: i32, %arg1: i32) -> (i32, i32) {
    %c0_i32 = arith.constant 0 : i32
    %0 = arith.cmpi eq, %arg0, %c0_i32 : i32
    %c0_i32_0 = arith.constant 0 : i32
    %1 = arith.select %0, %c0_i32_0, %arg1 : i32
    %c0_i32_1 = arith.constant 0 : i32
    %c0_i32_2 = arith.constant 0 : i32
    return %c0_i32_1, %1 : i32, i32
  }
  func.func @transform_2(%arg0: i32, %arg1: i32) -> (i32, i32, i32) {
    %c0_i32 = arith.constant 0 : i32
    %c0_i32_0 = arith.constant 0 : i32
    %c0_i32_1 = arith.constant 0 : i32
    return %arg0, %c0_i32, %c0_i32_0 : i32, i32, i32
  }
  func.func @transform_3(%arg0: i32, %arg1: i32) -> (i32, i32) {
    %c0_i32 = arith.constant 0 : i32
    %c0_i32_0 = arith.constant 0 : i32
    return %c0_i32, %arg1 : i32, i32
  }
}

</mosaic_0001>

<bundles_post_ra>
// kernel: cheb_conv.1
= control target key start
LH: loop header
LB: loop body
LE: loop exit
PB: predicated region body
PF: predicated region fallthrough
CT: control target
= control target key end

     0   :  { %s3033_s12 = smov 0   ;;  %s3035_s13 = smov 0   ;;  %s3499_s0 = inlined_call_operand.vmem [shape: bf16[32,384], index: 0, kind: input, shape index: {}]   ;;  %s3500_s1 = inlined_call_operand.vmem [shape: bf16[384,384], index: 1, kind: input, shape index: {}]   ;;  %s3501_s2 = inlined_call_operand.vmem [shape: bf16[3,32,32], index: 2, kind: input, shape index: {}]   ;;  %s3502_s3 = inlined_call_operand.vmem [shape: f32[32,384], index: 3, kind: output, shape index: {}]  }
   0x1   :  { %s3037_s14 = smov 0   ;;  %s3039_s15 = smov 0  }
   0x2   :  { %s3041_s16 = smov 0   ;;  %s3043_s17 = smov 0  }
   0x3   :  { %s3045_s18 = smov 0   ;;  %s3047_s19 = smov 0  }
   0x4   :  { %s3049_s20 = smov 0   ;;  %s3051_s21 = smov 0  }
   0x5   :  { %s3053_s22 = smov 0  }
   0x6 LB: > { %3505 = sst [smem:[#allocation8_spill]] %s3007_s21  ;;  %s22_s24 = sadd.s32 1, %s3003_s20  ;;  %s3011_s22 = sphi %s3053_s22, %s13_s22   ;;  %s3007_s21 = sphi %s3051_s21, %s3512_s21   ;;  %s3003_s20 = sphi %s3049_s20, %s3520_s20   ;;  %s2999_s19 = sphi %s3047_s19, %s3511_s19   ;;  %s2995_s18 = sphi %s3045_s18, %s3519_s18   ;;  %s2991_s17 = sphi %s3043_s17, %s3518_s17   ;;  %s2987_s16 = sphi %s3041_s16, %s3517_s16   ;;  %s2983_s15 = sphi %s3039_s15, %s3516_s15   ;;  %s2979_s14 = sphi %s3037_s14, %s3515_s14   ;;  %s2975_s13 = sphi %s3035_s13, %s3514_s13   ;;  %s2971_s12 = sphi %s3033_s12, %s3513_s12  }
   0x7   : > { %p23_p0 = scmp.ge.s32.totalorder %s22_s24, 3  ;;  %s25_s25 = sadd.s32 1, %s3007_s21 }
   0x8   : > { %p29_p1 = scmp.eq.s32.totalorder %s3007_s21, 0  ;;  %s36_s26 = sadd.s32 1, %s2991_s17 }
   0x9   : > { %s3522_s24 = smov (%p23_p0, %s22_s24), 0  ;;  %s3524_s25 = smov (!%p23_p0, %s25_s25), %s3007_s21 }
   0xa   : > { %s3099_s27 = scalar_select %p29_p1, %s3003_s20, 0 }
   0xb   : > { %p27_p2 = scmp.ge.s32.totalorder %s3524_s25, 3  ;;  %p43_p3 = scmp.ne.s32.totalorder %s2991_s17, %s2987_s16 }
   0xc   : > { %p44_p4 = scmp.eq.s32.totalorder %s3011_s22, 0  ;;  %s66_s28 = sadd.s32 1, %s2983_s15 }
   0xd   : > { %s3526_s25 = smov (%p27_p2, %s3524_s25), 0  ;;  %p73_p6 = scmp.ne.s32.totalorder %s2983_s15, %s2979_s14 }
   0xe   : > { %3506 = sst [smem:[#allocation9_spill]] %s3526_s25  ;;  %p3107_p5 = por %p44_p4, %p43_p3 }
   0xf   : > { %p31_p7 = scmp.eq.s32.totalorder %s3526_s25, 0  ;;  %s115_s30 = ssub.s32 %s3003_s20, %s3522_s24 }
  0x10   : > { %s3119_s4 = scalar_select %p29_p1, 0, %s3003_s20 }
  0x11   : > { %s32_s5 = scalar_select %p31_p7, %s3522_s24, 0 }
  0x12   : > { %s62_s6 = scalar_select %p31_p7, 0, %s3522_s24 }
  0x13   : > { %s33_s7 = ssub.s32 %s3099_s27, %s32_s5  ;;  %p3124_p8 = por %p73_p6, %p44_p4 }
  0x14   : > { %p34_p9 = scmp.eq.s32.totalorder %s33_s7, 0  ;;  %s63_s9 = ssub.s32 %s3119_s4, %s62_s6 }
  0x15   : > { %p64_p10 = scmp.eq.s32.totalorder %s63_s9, 0  ;;  %p116_p11 = scmp.eq.s32.totalorder %s115_s30, 0 }
  0x16   : > { %s3130_s10 = scalar_select %p34_p9, %s2991_s17, %s36_s26  }
  0x17   : > { %s3133_s11 = scalar_select %p64_p10, %s2983_s15, %s66_s28  }
  0x18   : > { %s118_s23 = sadd.s32 1, %s2975_s13  ;;  %p128_p12 = scmp.ne.s32.totalorder %s2975_s13, %s2971_s12 }
  0x19   : > { %s3139_s25 = scalar_select %p116_p11, %s2975_s13, %s118_s23  }
  0x1a   : > { %s3509_s21 = sadd.s32 4294967295, %s3011_s22   ;;  %p2277_p1 = scmp.ge.s32.totalorder %s3011_s22, 9 }
  0x1b   : > { %p129_p13 = scmp.eq.s32.totalorder %s3509_s21, 8 }
  0x1c   : > { %151 = sbr.rel (%p2277_p1) target bundleno = 78 (0x4e), region = 16 }
  0x1d   : > { %p3143_p0 = por %p129_p13, %p128_p12 }
  0x23   : > { %154 = sbr.rel (!%p3107_p5) target bundleno = 42 (0x2a), region = 20  ;;  %s156_s26 = sand.u32 (%p3107_p5), 1, %s2991_s17  }
  0x24   : > { %s2279_s28 = sshll.u32 (%p3107_p5), %s3099_s27, 2  ;;  %s2278_s30 = sshll.u32 (%p3107_p5), %s156_s26, 4 }
  0x25   : > { %s162_s7 = scalar_lea.vmem (%p3107_p5), %s3499_s0, %s2279_s28  ;;  %s158_s21 = scalar_lea.vmem (%p3107_p5), [#allocation5], %s2278_s30 }
  0x26   : > { %v178_v0 = vld [vmem:[%s162_s7] sm:$0xf] (%p3107_p5)  ;;  %v180_v1 = vld [vmem:[%s162_s7 + $0xc] sm:$0xf] (%p3107_p5)  ;;  %v182_v2 = vld [vmem:[%s162_s7 + $0x18] sm:$0xf] (%p3107_p5) }
  0x27   : > { %179 = vst [vmem:[%s158_s21] sm:$0xf] (%p3107_p5), %v178_v0  ;;  %181 = vst [vmem:[%s158_s21 + $0x4] sm:$0xf] (%p3107_p5), %v180_v1  ;;  %v184_v3 = vld [vmem:[%s162_s7 + $0x24] sm:$0xf] (%p3107_p5) }
  0x28   : > { %183 = vst [vmem:[%s158_s21 + $0x8] sm:$0xf] (%p3107_p5), %v182_v2  ;;  %185 = vst [vmem:[%s158_s21 + $0xc] sm:$0xf] (%p3107_p5), %v184_v3 }
  0x2a PF: > { %216 = sbr.rel (!%p3124_p8) target bundleno = 78 (0x4e), region = 61  ;;  %s218_s27 = sand.u32 (%p3124_p8), 1, %s2983_s15  }
  0x2b   : > { %s2280_s29 = sshll.u32 (%p3124_p8), %s3119_s4, 2  ;;  %s2761_s9 = smul.u32 (%p3124_p8), 192, %s218_s27 }
  0x2c   : > { %s3162_s6 = scalar_lea.vmem (%p3124_p8), %s3500_s1, %s2280_s29 }
  0x2d   : > { %v240_v4 = vld [vmem:[%s3162_s6] sm:$0xf] (%p3124_p8)  ;;  %v242_v5 = vld [vmem:[%s3162_s6 + $0xc] sm:$0xf] (%p3124_p8)  ;;  %v244_v6 = vld [vmem:[%s3162_s6 + $0x18] sm:$0xf] (%p3124_p8) }
  0x2e   : > { %v246_v7 = vld [vmem:[%s3162_s6 + $0x24] sm:$0xf] (%p3124_p8)  ;;  %v248_v8 = vld [vmem:[%s3162_s6 + $0x30] sm:$0xf] (%p3124_p8)  ;;  %s3169_s4 = scalar_lea.vmem (%p3124_p8), [#allocation6], %s2761_s9 }
  0x2f   : > { %241 = vst [vmem:[%s3169_s4] sm:$0xf] (%p3124_p8), %v240_v4  ;;  %243 = vst [vmem:[%s3169_s4 + $0x4] sm:$0xf] (%p3124_p8), %v242_v5  ;;  %v250_v9 = vld [vmem:[%s3162_s6 + $0x3c] sm:$0xf] (%p3124_p8) }
  0x30   : > { %245 = vst [vmem:[%s3169_s4 + $0x8] sm:$0xf] (%p3124_p8), %v244_v6  ;;  %247 = vst [vmem:[%s3169_s4 + $0xc] sm:$0xf] (%p3124_p8), %v246_v7  ;;  %v252_v10 = vld [vmem:[%s3162_s6 + $0x48] sm:$0xf] (%p3124_p8) }
  0x31   : > { %249 = vst [vmem:[%s3169_s4 + $0x10] sm:$0xf] %v248_v8  ;;  %v254_v11 = vld [vmem:[%s3162_s6 + $0x54] sm:$0xf]  ;;  %251 = vst [vmem:[%s3169_s4 + $0x14] sm:$0xf] %v250_v9 }
  0x32   : > { %253 = vst [vmem:[%s3169_s4 + $0x18] sm:$0xf] %v252_v10  ;;  %255 = vst [vmem:[%s3169_s4 + $0x1c] sm:$0xf] %v254_v11  ;;  %v256_v12 = vld [vmem:[%s3162_s6 + $0x60] sm:$0xf] }
  0x33   : > { %v258_v13 = vld [vmem:[%s3162_s6 + $0x6c] sm:$0xf]  ;;  %v260_v14 = vld [vmem:[%s3162_s6 + $0x78] sm:$0xf]  ;;  %257 = vst [vmem:[%s3169_s4 + $0x20] sm:$0xf] %v256_v12 }
  0x34   : > { %259 = vst [vmem:[%s3169_s4 + $0x24] sm:$0xf] %v258_v13  ;;  %261 = vst [vmem:[%s3169_s4 + $0x28] sm:$0xf] %v260_v14  ;;  %v262_v15 = vld [vmem:[%s3162_s6 + $0x84] sm:$0xf] }
  0x35   : > { %v264_v16 = vld [vmem:[%s3162_s6 + $0x90] sm:$0xf]  ;;  %v266_v17 = vld [vmem:[%s3162_s6 + $0x9c] sm:$0xf]  ;;  %263 = vst [vmem:[%s3169_s4 + $0x2c] sm:$0xf] %v262_v15 }
  0x36   : > { %265 = vst [vmem:[%s3169_s4 + $0x30] sm:$0xf] %v264_v16  ;;  %267 = vst [vmem:[%s3169_s4 + $0x34] sm:$0xf] %v266_v17  ;;  %v268_v18 = vld [vmem:[%s3162_s6 + $0xa8] sm:$0xf] }
  0x37   : > { %v270_v19 = vld [vmem:[%s3162_s6 + $0xb4] sm:$0xf]  ;;  %v272_v20 = vld [vmem:[%s3162_s6 + $0xc0] sm:$0xf]  ;;  %269 = vst [vmem:[%s3169_s4 + $0x38] sm:$0xf] %v268_v18 }
  0x38   : > { %271 = vst [vmem:[%s3169_s4 + $0x3c] sm:$0xf] %v270_v19  ;;  %273 = vst [vmem:[%s3169_s4 + $0x40] sm:$0xf] %v272_v20  ;;  %v274_v21 = vld [vmem:[%s3162_s6 + $0xcc] sm:$0xf] }
  0x39   : > { %v276_v22 = vld [vmem:[%s3162_s6 + $0xd8] sm:$0xf]  ;;  %v278_v23 = vld [vmem:[%s3162_s6 + $0xe4] sm:$0xf]  ;;  %275 = vst [vmem:[%s3169_s4 + $0x44] sm:$0xf] %v274_v21 }
  0x3a   : > { %277 = vst [vmem:[%s3169_s4 + $0x48] sm:$0xf] %v276_v22  ;;  %279 = vst [vmem:[%s3169_s4 + $0x4c] sm:$0xf] %v278_v23  ;;  %v280_v24 = vld [vmem:[%s3162_s6 + $0xf0] sm:$0xf] }
  0x3b   : > { %v282_v25 = vld [vmem:[%s3162_s6 + $0xfc] sm:$0xf]  ;;  %v284_v26 = vld [vmem:[%s3162_s6 + $0x108] sm:$0xf]  ;;  %281 = vst [vmem:[%s3169_s4 + $0x50] sm:$0xf] %v280_v24 }
  0x3c   : > { %283 = vst [vmem:[%s3169_s4 + $0x54] sm:$0xf] %v282_v25  ;;  %285 = vst [vmem:[%s3169_s4 + $0x58] sm:$0xf] %v284_v26  ;;  %v286_v27 = vld [vmem:[%s3162_s6 + $0x114] sm:$0xf] }
  0x3d   : > { %v288_v28 = vld [vmem:[%s3162_s6 + $0x120] sm:$0xf]  ;;  %v290_v29 = vld [vmem:[%s3162_s6 + $0x12c] sm:$0xf]  ;;  %287 = vst [vmem:[%s3169_s4 + $0x5c] sm:$0xf] %v286_v27 }
  0x3e   : > { %289 = vst [vmem:[%s3169_s4 + $0x60] sm:$0xf] %v288_v28  ;;  %291 = vst [vmem:[%s3169_s4 + $0x64] sm:$0xf] %v290_v29  ;;  %v292_v30 = vld [vmem:[%s3162_s6 + $0x138] sm:$0xf] }
  0x3f   : > { %v294_v31 = vld [vmem:[%s3162_s6 + $0x144] sm:$0xf]  ;;  %v296_v32 = vld [vmem:[%s3162_s6 + $0x150] sm:$0xf]  ;;  %293 = vst [vmem:[%s3169_s4 + $0x68] sm:$0xf] %v292_v30 }
  0x40   : > { %295 = vst [vmem:[%s3169_s4 + $0x6c] sm:$0xf] %v294_v31  ;;  %297 = vst [vmem:[%s3169_s4 + $0x70] sm:$0xf] %v296_v32  ;;  %v298_v33 = vld [vmem:[%s3162_s6 + $0x15c] sm:$0xf] }
  0x41   : > { %v300_v34 = vld [vmem:[%s3162_s6 + $0x168] sm:$0xf]  ;;  %v302_v35 = vld [vmem:[%s3162_s6 + $0x174] sm:$0xf]  ;;  %299 = vst [vmem:[%s3169_s4 + $0x74] sm:$0xf] %v298_v33 }
  0x42   : > { %301 = vst [vmem:[%s3169_s4 + $0x78] sm:$0xf] %v300_v34  ;;  %303 = vst [vmem:[%s3169_s4 + $0x7c] sm:$0xf] %v302_v35  ;;  %v304_v36 = vld [vmem:[%s3162_s6 + $0x180] sm:$0xf] }
  0x43   : > { %v306_v37 = vld [vmem:[%s3162_s6 + $0x18c] sm:$0xf]  ;;  %v308_v38 = vld [vmem:[%s3162_s6 + $0x198] sm:$0xf]  ;;  %305 = vst [vmem:[%s3169_s4 + $0x80] sm:$0xf] %v304_v36 }
  0x44   : > { %307 = vst [vmem:[%s3169_s4 + $0x84] sm:$0xf] %v306_v37  ;;  %309 = vst [vmem:[%s3169_s4 + $0x88] sm:$0xf] %v308_v38  ;;  %v310_v39 = vld [vmem:[%s3162_s6 + $0x1a4] sm:$0xf] }
  0x45   : > { %v312_v40 = vld [vmem:[%s3162_s6 + $0x1b0] sm:$0xf]  ;;  %v314_v41 = vld [vmem:[%s3162_s6 + $0x1bc] sm:$0xf]  ;;  %311 = vst [vmem:[%s3169_s4 + $0x8c] sm:$0xf] %v310_v39 }
  0x46   : > { %313 = vst [vmem:[%s3169_s4 + $0x90] sm:$0xf] %v312_v40  ;;  %315 = vst [vmem:[%s3169_s4 + $0x94] sm:$0xf] %v314_v41  ;;  %v316_v42 = vld [vmem:[%s3162_s6 + $0x1c8] sm:$0xf] }
  0x47   : > { %v318_v43 = vld [vmem:[%s3162_s6 + $0x1d4] sm:$0xf]  ;;  %v320_v44 = vld [vmem:[%s3162_s6 + $0x1e0] sm:$0xf]  ;;  %317 = vst [vmem:[%s3169_s4 + $0x98] sm:$0xf] %v316_v42 }
  0x48   : > { %319 = vst [vmem:[%s3169_s4 + $0x9c] sm:$0xf] %v318_v43  ;;  %321 = vst [vmem:[%s3169_s4 + $0xa0] sm:$0xf] %v320_v44  ;;  %v322_v45 = vld [vmem:[%s3162_s6 + $0x1ec] sm:$0xf] }
  0x49   : > { %v324_v46 = vld [vmem:[%s3162_s6 + $0x1f8] sm:$0xf]  ;;  %v326_v47 = vld [vmem:[%s3162_s6 + $0x204] sm:$0xf]  ;;  %323 = vst [vmem:[%s3169_s4 + $0xa4] sm:$0xf] %v322_v45 }
  0x4a   : > { %325 = vst [vmem:[%s3169_s4 + $0xa8] sm:$0xf] %v324_v46  ;;  %327 = vst [vmem:[%s3169_s4 + $0xac] sm:$0xf] %v326_v47  ;;  %v328_v48 = vld [vmem:[%s3162_s6 + $0x210] sm:$0xf] }
  0x4b   : > { %v330_v49 = vld [vmem:[%s3162_s6 + $0x21c] sm:$0xf]  ;;  %v332_v50 = vld [vmem:[%s3162_s6 + $0x228] sm:$0xf]  ;;  %329 = vst [vmem:[%s3169_s4 + $0xb0] sm:$0xf] %v328_v48 }
  0x4c   : > { %331 = vst [vmem:[%s3169_s4 + $0xb4] sm:$0xf] %v330_v49  ;;  %333 = vst [vmem:[%s3169_s4 + $0xb8] sm:$0xf] %v332_v50  ;;  %v334_v51 = vld [vmem:[%s3162_s6 + $0x234] sm:$0xf] }
  0x4d   : > { %335 = vst [vmem:[%s3169_s4 + $0xbc] sm:$0xf] %v334_v51 }
  0x4e PF: > { %p2281_p2 = scmp.ge.s32.totalorder %s3011_s22, 1  ;;  %p461_p3 = scmp.lt.s32.totalorder %s3011_s22, 10 }
  0x50   : > { %p462_p4 = pnand %p2281_p2, %p461_p3 }
  0x51   : > { %s468_s8 = sand.u32 (!%p462_p4), 1, %s2987_s16   ;;  %s475_s30 = sand.u32 (!%p462_p4), 1, %s2979_s14  }
  0x52   : > { %465 = sbr.rel (%p462_p4) target bundleno = 1949 (0x79d), region = 106  ;;  %s2282_s23 = sshll.u32 (!%p462_p4), %s468_s8, 4 }
  0x53   : > { %s2762_s7 = smul.u32 (!%p462_p4), 192, %s475_s30  ;;  %s503_s21 = sand.u32 (!%p462_p4), 1, %s2971_s12  }
  0x54   : > { %s2283_s27 = sshll.u32 (!%p462_p4), %s503_s21, 5  ;;  %p510_p5 = scmp.lt.s32.totalorder (!%p462_p4), %s2999_s19, 2 }
  0x55   : > { %s470_s14 = scalar_lea.vmem (!%p462_p4), [#allocation5], %s2282_s23  ;;  %s3280_s16 = scalar_lea.vmem (!%p462_p4), [#allocation6], %s2762_s7 }
  0x56   : > { %s3282_s12 = scalar_lea.vmem (!%p462_p4), [#allocation7], %s2283_s27  ;;  %p2286_p6 = scmp.ne.s32.totalorder (!%p462_p4), %s2999_s19, 0 }
  0x59   : > { %s511_s29 = scalar_select %p510_p5, %s2999_s19, 2 }
  0x5a   : > { %523 = sbr.rel (%p2286_p6) target bundleno = 334 (0x14e), region = 118  ;;  %v2851_v56 = vld [vmem:[%s470_s14] sm:$0xff] (!%p2286_p6)   ;;  %s2415_s4 = sshll.u32 (!%p2286_p6), %s2995_s18, 4  ;;  %v2852_v58 = vld [vmem:[%s470_s14 + $0x8] sm:$0xff] (!%p2286_p6)   ;;  %vm555_vm0 = vcmask (!%p2286_p6), 261120  }
  0x5b   : > { %s2414_s9 = sshll.u32 %s511_s29, 4  ;;  %s542_s8 = scalar_lea.vmem (!%p2286_p6), [#allocation2], %s2415_s4  ;;  %2525 = vmatprep.subr.bf16.mxu0 (!%p2286_p6), %v2851_v56 }
  0x5c   : > { %s514_s6 = scalar_lea.vmem %s3501_s2, %s2414_s9  ;;  %543 = vst [vmem:[%s542_s8] sm:$0xff] (!%p2286_p6), %v2851_v56  ;;  %2526 = vmatpush3.bf16.msra.mxu0 (!%p2286_p6), %v2851_v56  ;;  %544 = vst [vmem:[%s542_s8 + $0x8] sm:$0xff] (!%p2286_p6), %v2852_v58  ;;  %s2295_s30 = sshll.u32 (!%p2286_p6), %s2995_s18, 5 }
  0x5d   : > { %v3272_v52 = vld [vmem:[%s514_s6] sm:$0xf]  ;;  %v3274_v53 = vld [vmem:[%s514_s6 + $0x4] sm:$0xf]  ;;  %v3276_v54 = vld [vmem:[%s514_s6 + $0x8] sm:$0xf]  ;;  %2527 = vmatprep.subr.bf16.mxu0 (!%p2286_p6), %v2852_v58 }
  0x5e   : > { %v3278_v55 = vld [vmem:[%s514_s6 + $0xc] sm:$0xf]  ;;  %v2291_v57 = vcombine.low (!%p2286_p6), %v3272_v52, %v3274_v53  ;;  %s3293_s23 = scalar_lea.vmem (!%p2286_p6), [#allocation4], %s2295_s30  ;;  %p2296_p7 = scmp.le.s32.totalorder (!%p2286_p6), %s2999_s19, 0 }
  0x5f   : > { %v2292_v59 = vcombine.low (!%p2286_p6), %v3276_v54, %v3278_v55 }
  0x60   : > { %2529 = vmatprep.mubr.msk.bf16.mxu0 (!%p2286_p6), %vm555_vm0, %v2291_v57  ;;  %2528 = vmatpush3.bf16.msra.mxu0 (!%p2286_p6), %v2852_v58 }
  0x63   : > { %2530 = vmatmul.mubr.msk.bf16.vlgmr.msra.gmra.mrb[0].mxu0 %vm555_vm0, %v2292_v59 }
 0x134   : > { %620 = sbr.rel (%p2296_p7) target bundleno = 325 (0x145), region = 122 }
 0x136   : > { %v2531_v60 = vpop.f32.mrb[0].mxu0 }
 0x137   : > { %615 = vst [vmem:[%s3293_s23 + $0x10] sm:$0xff] %v2531_v60  ;;  %v596_v61 = vpop.f32.mrb[1].mxu0 }
 0x138   : > { %613 = vst [vmem:[%s3293_s23] sm:$0xff] %v596_v61  ;;  %v2532_v62 = vpop.f32.mrb[2].mxu0 }
 0x139   : > { %616 = vst [vmem:[%s3293_s23 + $0x18] sm:$0xff] %v2532_v62  ;;  %v599_v63 = vpop.f32.mrb[3].mxu0 }
 0x13a   : > { %614 = vst [vmem:[%s3293_s23 + $0x8] sm:$0xff] %v599_v63 }
 0x13e   : > { %v623_v2 = vld [vmem:[%s3293_s23 + $0x10] sm:$0xff] }
 0x13f   : > { %v621_v0 = vld [vmem:[%s3293_s23] sm:$0xff]  ;;  %v627_v5 = vadd.f32 %v2531_v60, %v623_v2 }
 0x140   : > { %v625_v3 = vadd.f32 %v621_v0, %v596_v61  ;;  %v624_v6 = vld [vmem:[%s3293_s23 + $0x18] sm:$0xff] }
 0x141   : > { %v622_v1 = vld [vmem:[%s3293_s23 + $0x8] sm:$0xff]  ;;  %v628_v7 = vadd.f32 %v2532_v62, %v624_v6  ;;  %631 = vst [vmem:[%s3293_s23 + $0x10] sm:$0xff] %v627_v5 }
 0x142   : > { %v626_v4 = vadd.f32 %v622_v1, %v599_v63  ;;  %629 = vst [vmem:[%s3293_s23] sm:$0xff] %v625_v3 }
 0x143   : > { %632 = vst [vmem:[%s3293_s23 + $0x18] sm:$0xff] %v628_v7 }
 0x144   : > { %630 = vst [vmem:[%s3293_s23 + $0x8] sm:$0xff] %v626_v4 }
 0x145 PF: > { %p2297_p8 = scmp.ne.s32.totalorder %s2999_s19, 2 }
 0x147   : > { %636 = sbr.rel (%p2297_p8) target bundleno = 334 (0x14e), region = 126 }
 0x148   : > { %v639_v10 = vld [vmem:[%s3293_s23 + $0x10] sm:$0xff] (!%p2297_p8) }
 0x149   : > { %v637_v8 = vld [vmem:[%s3293_s23] sm:$0xff] (!%p2297_p8)  ;;  %643 = vst [vmem:[%s3282_s12 + $0x10] sm:$0xff] (!%p2297_p8), %v639_v10 }
 0x14a   : > { %641 = vst [vmem:[%s3282_s12] sm:$0xff] (!%p2297_p8), %v637_v8  ;;  %v640_v11 = vld [vmem:[%s3293_s23 + $0x18] sm:$0xff] (!%p2297_p8) }
 0x14b   : > { %v638_v9 = vld [vmem:[%s3293_s23 + $0x8] sm:$0xff] (!%p2297_p8)  ;;  %644 = vst [vmem:[%s3282_s12 + $0x18] sm:$0xff] (!%p2297_p8), %v640_v11 }
 0x14c   : > { %642 = vst [vmem:[%s3282_s12 + $0x8] sm:$0xff] (!%p2297_p8), %v638_v9 }
 0x14e PF: > { %p2298_p9 = scmp.ne.s32.totalorder %s2999_s19, 1 }
 0x14f   : > { %v2853_v12 = vld [vmem:[%s3280_s16] sm:$0xff] (!%p2298_p9)   ;;  %v2854_v13 = vld [vmem:[%s3280_s16 + $0x8] sm:$0xff] (!%p2298_p9)   ;;  %v2855_v14 = vld [vmem:[%s3280_s16 + $0x10] sm:$0xff] (!%p2298_p9)   ;;  %v2325_v42 = vcombine.low (!%p2298_p9), %v3272_v52, %v3274_v53  ;;  %vm1017_vm1 = vcmask (!%p2298_p9), 261120   ;;  %s2416_s7 = sshll.u32 (!%p2298_p9), %s2995_s18, 4  ;;  %v2326_v61 = vcombine.low (!%p2298_p9), %v3276_v54, %v3278_v55 }
 0x150   : > { %648 = sbr.rel (%p2298_p9) target bundleno = 863 (0x35f), region = 130  ;;  %2553 = vmatprep.subr.bf16.mxu0 (!%p2298_p9), %v2853_v12  ;;  %v2856_v15 = vld [vmem:[%s3280_s16 + $0x18] sm:$0xff] (!%p2298_p9)   ;;  %v2861_v16 = vld [vmem:[%s3280_s16 + $0x40] sm:$0xff] (!%p2298_p9)   ;;  %v2863_v18 = vld [vmem:[%s3280_s16 + $0x48] sm:$0xff] (!%p2298_p9)   ;;  %s1004_s21 = scalar_lea.vmem (!%p2298_p9), [#allocation3], %s2416_s7 }
 0x151   : > { %2554 = vmatpush3.bf16.msra.mxu0 (!%p2298_p9), %v2853_v12  ;;  %v649_v17 = vld [vmem:[#allocation2] sm:$0xff] (!%p2298_p9)  ;;  %2533 = vmatprep.subr.bf16.mxu1 (!%p2298_p9), %v2861_v16  ;;  %v2865_v20 = vld [vmem:[%s3280_s16 + $0x50] sm:$0xff] (!%p2298_p9)   ;;  %v2858_v21 = vld [vmem:[%s3280_s16 + $0x28] sm:$0xff] (!%p2298_p9)  }
 0x152   : > { %2555 = vmatprep.subr.bf16.mxu0 (!%p2298_p9), %v2854_v13  ;;  %2569 = vmatprep.mubr.bf16.mxu0 (!%p2298_p9), %v649_v17  ;;  %v2857_v19 = vld [vmem:[%s3280_s16 + $0x20] sm:$0xff] (!%p2298_p9)   ;;  %v2867_v22 = vld [vmem:[%s3280_s16 + $0x58] sm:$0xff] (!%p2298_p9)   ;;  %v2859_v23 = vld [vmem:[%s3280_s16 + $0x30] sm:$0xff] (!%p2298_p9)  }
 0x153   : > { %2534 = vmatpush3.bf16.msra.mxu1 (!%p2298_p9), %v2861_v16  ;;  %v2869_v24 = vld [vmem:[%s3280_s16 + $0x60] sm:$0xff] (!%p2298_p9)   ;;  %v2860_v25 = vld [vmem:[%s3280_s16 + $0x38] sm:$0xff] (!%p2298_p9)   ;;  %v668_v26 = vld [vmem:[#allocation2 + $0x10] sm:$0xff] (!%p2298_p9) }
 0x154   : > { %2535 = vmatprep.subr.bf16.mxu1 (!%p2298_p9), %v2863_v18  ;;  %v2871_v27 = vld [vmem:[%s3280_s16 + $0x68] sm:$0xff] (!%p2298_p9)   ;;  %2549 = vmatprep.mubr.bf16.mxu1 (!%p2298_p9), %v668_v26  ;;  %v2862_v28 = vld [vmem:[%s3280_s16 + $0x80] sm:$0xff] (!%p2298_p9)   ;;  %v2873_v29 = vld [vmem:[%s3280_s16 + $0x70] sm:$0xff] (!%p2298_p9)  }
 0x155   : > { %2556 = vmatpush3.bf16.msra.mxu0 (!%p2298_p9), %v2854_v13  ;;  %v650_v30 = vld [vmem:[#allocation2 + $0x8] sm:$0xff] (!%p2298_p9)  ;;  %v2875_v32 = vld [vmem:[%s3280_s16 + $0x78] sm:$0xff] (!%p2298_p9)   ;;  %v881_v33 = vld [vmem:[#allocation2 + $0x20] sm:$0xff] (!%p2298_p9) }
 0x156   : > { %2557 = vmatprep.subr.bf16.mxu0 (!%p2298_p9), %v2855_v14  ;;  %v2864_v31 = vld [vmem:[%s3280_s16 + $0x88] sm:$0xff] (!%p2298_p9)   ;;  %v2866_v34 = vld [vmem:[%s3280_s16 + $0x90] sm:$0xff] (!%p2298_p9)   ;;  %v669_v35 = vld [vmem:[#allocation2 + $0x18] sm:$0xff] (!%p2298_p9) }
 0x157   : > { %2536 = vmatpush3.bf16.msra.mxu1 %v2863_v18  ;;  %v2868_v36 = vld [vmem:[%s3280_s16 + $0x98] sm:$0xff]   ;;  %v2870_v37 = vld [vmem:[%s3280_s16 + $0xa0] sm:$0xff]   ;;  %v2872_v38 = vld [vmem:[%s3280_s16 + $0xa8] sm:$0xff]   ;;  %s2330_s27 = sshll.u32 (!%p2286_p6), %s2995_s18, 5 }
 0x158   : > { %2537 = vmatprep.subr.bf16.mxu1 %v2865_v20  ;;  %v2874_v39 = vld [vmem:[%s3280_s16 + $0xb0] sm:$0xff]   ;;  %v2876_v40 = vld [vmem:[%s3280_s16 + $0xb8] sm:$0xff]   ;;  %v882_v41 = vld [vmem:[#allocation2 + $0x28] sm:$0xff]  ;;  %s1077_s29 = scalar_lea.vmem (!%p2286_p6), [#allocation4], %s2330_s27 }
 0x159   : > { %2558 = vmatpush3.bf16.msra.mxu0 %v2855_v14 }
 0x15a   : > { %2559 = vmatprep.subr.bf16.mxu0 %v2856_v15 }
 0x15b   : > { %2538 = vmatpush3.bf16.msra.mxu1 %v2865_v20 }
 0x15c   : > { %2539 = vmatprep.subr.bf16.mxu1 %v2867_v22 }
 0x15d   : > { %2560 = vmatpush3.bf16.msra.mxu0 %v2856_v15 }
 0x15e   : > { %2561 = vmatprep.subr.bf16.mxu0 %v2857_v19 }
 0x15f   : > { %2540 = vmatpush3.bf16.msra.mxu1 %v2867_v22 }
 0x160   : > { %2541 = vmatprep.subr.bf16.mxu1 %v2869_v24 }
 0x161   : > { %2562 = vmatpush3.bf16.msra.mxu0 %v2857_v19 }
 0x162   : > { %2563 = vmatprep.subr.bf16.mxu0 %v2858_v21 }
 0x163   : > { %2542 = vmatpush3.bf16.msra.mxu1 %v2869_v24 }
 0x164   : > { %2543 = vmatprep.subr.bf16.mxu1 %v2871_v27 }
 0x165   : > { %2564 = vmatpush3.bf16.msra.mxu0 %v2858_v21 }
 0x166   : > { %2565 = vmatprep.subr.bf16.mxu0 %v2859_v23 }
 0x167   : > { %2544 = vmatpush3.bf16.msra.mxu1 %v2871_v27 }
 0x168   : > { %2545 = vmatprep.subr.bf16.mxu1 %v2873_v29 }
 0x169   : > { %2566 = vmatpush3.bf16.msra.mxu0 %v2859_v23 }
 0x16a   : > { %2567 = vmatprep.subr.bf16.mxu0 %v2860_v25 }
 0x16b   : > { %2546 = vmatpush3.bf16.msra.mxu1 %v2873_v29 }
 0x16c   : > { %2547 = vmatprep.subr.bf16.mxu1 %v2875_v32 }
 0x16d   : > { %2568 = vmatpush3.bf16.msra.mxu0 %v2860_v25 }
 0x16e   : > { %2573 = vmatprep.subr.bf16.mxu0 %v2862_v28 }
 0x16f   : > { %2548 = vmatpush3.bf16.msra.mxu1 %v2875_v32 }
 0x170   : > { %2570 = vmatmul.mubr.bf16.vlgmr.msra.gmra.mrb[0].mxu0 %v650_v30 }
 0x171   : > { %2574 = vmatpush3.bf16.msra.mxu0 %v2862_v28  ;;  %2589 = vmatprep.mubr.bf16.mxu0 %v881_v33 }
 0x172   : > { %2575 = vmatprep.subr.bf16.mxu0 %v2864_v31  ;;  %2550 = vmatmul.mubr.bf16.vlgmr.msra.gmra.mrb[0].mxu1 %v669_v35 }
 0x173   : > { %2597 = vmatprep.mubr.msk.bf16.mxu1 %vm1017_vm1, %v2325_v42 }
 0x175   : > { %2576 = vmatpush3.bf16.msra.mxu0 %v2864_v31 }
 0x176   : > { %2577 = vmatprep.subr.bf16.mxu0 %v2866_v34 }
 0x179   : > { %2578 = vmatpush3.bf16.msra.mxu0 %v2866_v34 }
 0x17a   : > { %2579 = vmatprep.subr.bf16.mxu0 %v2868_v36 }
 0x17d   : > { %2580 = vmatpush3.bf16.msra.mxu0 %v2868_v36 }
 0x17e   : > { %2581 = vmatprep.subr.bf16.mxu0 %v2870_v37 }
 0x181   : > { %2582 = vmatpush3.bf16.msra.mxu0 %v2870_v37 }
 0x182   : > { %2583 = vmatprep.subr.bf16.mxu0 %v2872_v38 }
 0x185   : > { %2584 = vmatpush3.bf16.msra.mxu0 %v2872_v38 }
 0x186   : > { %2585 = vmatprep.subr.bf16.mxu0 %v2874_v39 }
 0x189   : > { %2586 = vmatpush3.bf16.msra.mxu0 %v2874_v39 }
 0x18a   : > { %2587 = vmatprep.subr.bf16.mxu0 %v2876_v40 }
 0x18d   : > { %2588 = vmatpush3.bf16.msra.mxu0 %v2876_v40 }
 0x190   : > { %2590 = vmatmul.mubr.bf16.vlgmr.msra.gmra.mrb[0].mxu0 %v882_v41 }
 0x245   : > { %v2551_v43 = vpop.f32.mrb[0].mxu1 }
 0x246   : > { %v768_v44 = vpop.f32.mrb[1].mxu1 }
 0x247   : > { %v2552_v45 = vpop.f32.mrb[2].mxu1 }
 0x248   : > { %v771_v46 = vpop.f32.mrb[3].mxu1 }
 0x263   : > { %v2591_v47 = vpop.f32.mrb[0].mxu0 }
 0x264   : > { %v2737_v48 = vadd.f32 %v2591_v47, %v2551_v43  ;;  %v981_v49 = vpop.f32.mrb[1].mxu0 }
 0x265   : > { %v2738_v50 = vadd.f32 %v981_v49, %v768_v44  ;;  %v2592_v51 = vpop.f32.mrb[2].mxu0 }
 0x266   : > { %v2739_v56 = vadd.f32 %v2592_v51, %v2552_v45  ;;  %v984_v57 = vpop.f32.mrb[3].mxu0 }
 0x267   : > { %v2740_v58 = vadd.f32 %v984_v57, %v771_v46 }
 0x268   : > { %v1001_v59 = vpack.c.bf16 %v2739_v56, %v2737_v48 }
 0x269   : > { %v1000_v60 = vpack.c.bf16 %v2740_v58, %v2738_v50 }
 0x26a   : > { %1006 = vst [vmem:[%s1004_s21 + $0x8] sm:$0xff] %v1001_v59 }
 0x26b   : > { %1005 = vst [vmem:[%s1004_s21] sm:$0xff] %v1000_v60  ;;  %2593 = vmatprep.subr.bf16.mxu1 %v1000_v60 }
 0x26c   : > { %2594 = vmatpush3.bf16.msra.mxu1 %v1000_v60 }
 0x26d   : > { %2595 = vmatprep.subr.bf16.mxu1 %v1001_v59 }
 0x270   : > { %2596 = vmatpush3.bf16.msra.mxu1 %v1001_v59 }
 0x273   : > { %2598 = vmatmul.mubr.msk.bf16.vlgmr.msra.gmra.mrb[4].mxu1 %vm1017_vm1, %v2326_v61 }
 0x343   : > { %1075 = sbr.rel (%p2286_p6) target bundleno = 843 (0x34b), region = 134 }
 0x346   : > { %v2599_v62 = vpop.f32.mrb[4].mxu1 }
 0x347   : > { %v1058_v63 = vpop.f32.mrb[5].mxu1  ;;  %1080 = vst [vmem:[%s1077_s29 + $0x10] sm:$0xff] (!%p2286_p6), %v2599_v62 }
 0x348   : > { %v2600_v0 = vpop.f32.mrb[6].mxu1  ;;  %1078 = vst [vmem:[%s1077_s29] sm:$0xff] (!%p2286_p6), %v1058_v63 }
 0x349   : > { %v1061_v1 = vpop.f32.mrb[7].mxu1  ;;  %1081 = vst [vmem:[%s1077_s29 + $0x18] sm:$0xff] (!%p2286_p6), %v2600_v0 }
 0x34a   : > { %1079 = vst [vmem:[%s1077_s29 + $0x8] sm:$0xff] %v1061_v1 }
 0x34b PF: > { %p2331_p10 = scmp.le.s32.totalorder %s2999_s19, 0 }
 0x34c   : > { %s2332_s9 = sshll.u32 (!%p2331_p10), %s2995_s18, 5 }
 0x34d   : > { %1085 = sbr.rel (%p2331_p10) target bundleno = 854 (0x356), region = 138  ;;  %s1087_s26 = scalar_lea.vmem (!%p2331_p10), [#allocation4], %s2332_s9 }
 0x351   : > { %v1088_v2 = vld [vmem:[%s1087_s26] sm:$0xff] (!%p2331_p10)  ;;  %v1089_v3 = vld [vmem:[%s1087_s26 + $0x8] sm:$0xff] (!%p2331_p10)  ;;  %v1090_v4 = vld [vmem:[%s1087_s26 + $0x10] sm:$0xff] (!%p2331_p10) }
 0x352   : > { %v1092_v5 = vadd.f32 (!%p2331_p10), %v1088_v2, %v1058_v63  ;;  %v1093_v6 = vadd.f32 (!%p2331_p10), %v1089_v3, %v1061_v1  ;;  %v1094_v7 = vadd.f32 (!%p2331_p10), %v2599_v62, %v1090_v4  ;;  %v1091_v8 = vld [vmem:[%s1087_s26 + $0x18] sm:$0xff] (!%p2331_p10) }
 0x353   : > { %v1095_v9 = vadd.f32 (!%p2331_p10), %v2600_v0, %v1091_v8 }
 0x354   : > { %1096 = vst [vmem:[%s1087_s26] sm:$0xff] %v1092_v5  ;;  %1097 = vst [vmem:[%s1087_s26 + $0x8] sm:$0xff] %v1093_v6 }
 0x355   : > { %1098 = vst [vmem:[%s1087_s26 + $0x10] sm:$0xff] %v1094_v7  ;;  %1099 = vst [vmem:[%s1087_s26 + $0x18] sm:$0xff] %v1095_v9 }
 0x356 PF: > { %p2333_p11 = scmp.ne.s32.totalorder %s2999_s19, 2 }
 0x357   : > { %s2334_s28 = sshll.u32 (!%p2333_p11), %s2995_s18, 5 }
 0x358   : > { %1103 = sbr.rel (%p2333_p11) target bundleno = 863 (0x35f), region = 142  ;;  %s1105_s6 = scalar_lea.vmem (!%p2333_p11), [#allocation4], %s2334_s28 }
 0x35c   : > { %v1106_v10 = vld [vmem:[%s1105_s6] sm:$0xff] (!%p2333_p11)  ;;  %v1107_v11 = vld [vmem:[%s1105_s6 + $0x8] sm:$0xff] (!%p2333_p11)  ;;  %v1108_v12 = vld [vmem:[%s1105_s6 + $0x10] sm:$0xff] (!%p2333_p11) }
 0x35d   : > { %1110 = vst [vmem:[%s3282_s12] sm:$0xff] (!%p2333_p11), %v1106_v10  ;;  %1111 = vst [vmem:[%s3282_s12 + $0x8] sm:$0xff] (!%p2333_p11), %v1107_v11  ;;  %v1109_v13 = vld [vmem:[%s1105_s6 + $0x18] sm:$0xff] (!%p2333_p11) }
 0x35e   : > { %1112 = vst [vmem:[%s3282_s12 + $0x10] sm:$0xff] (!%p2333_p11), %v1108_v12  ;;  %1113 = vst [vmem:[%s3282_s12 + $0x18] sm:$0xff] (!%p2333_p11), %v1109_v13 }
 0x35f PF: > { %p1115_p12 = scmp.lt.s32.totalorder %s2999_s19, 0  ;;  %s1116_s14 = ssub.s32 0, %s2999_s19 }
 0x360   : > { %s2335_s4 = smin.u32 %s2999_s19, %s1116_s14  ;;  %p1114_p1 = scmp.ge.s32.totalorder %s2999_s19, 2 }
 0x361   : > { %s1118_s8 = sand.u32 1, %s2335_s4  }
 0x362   : > { %s1119_s30 = ssub.s32 0, %s1118_s8 }
 0x363   : > { %s3528_s30 = smov (!%p1115_p12, %s1119_s30), %s1118_s8 }
 0x364   : > { %p2337_p13 = scmp.lt.s32.totalorder %s3528_s30, 0  ;;  %s1125_s23 = sadd.s32 2, %s3528_s30 }
 0x366   : > { %s3530_s23 = smov (!%p2337_p13, %s1125_s23), %s3528_s30 }
 0x367   : > { %p1127_p2 = scmp.eq.s32.totalorder %s3530_s23, 0 }
 0x369   : > { %p1128_p3 = pnand %p1127_p2, %p1114_p1 }
 0x36a   : > { %v2877_v14 = vld [vmem:[%s3280_s16] sm:$0xff] (!%p1128_p3)   ;;  %v2878_v15 = vld [vmem:[%s3280_s16 + $0x8] sm:$0xff] (!%p1128_p3)   ;;  %v2879_v16 = vld [vmem:[%s3280_s16 + $0x10] sm:$0xff] (!%p1128_p3)   ;;  %v2364_v44 = vcombine.low (!%p1128_p3), %v3272_v52, %v3274_v53  ;;  %vm1514_vm2 = vcmask (!%p1128_p3), 261120   ;;  %s2417_s7 = sshll.u32 (!%p1128_p3), %s2995_s18, 4  ;;  %v2365_v13 = vcombine.low (!%p1128_p3), %v3276_v54, %v3278_v55 }
 0x36b   : > { %1131 = sbr.rel (%p1128_p3) target bundleno = 1406 (0x57e), region = 146  ;;  %2621 = vmatprep.subr.bf16.mxu0 (!%p1128_p3), %v2877_v14  ;;  %v2880_v17 = vld [vmem:[%s3280_s16 + $0x18] sm:$0xff] (!%p1128_p3)   ;;  %v2885_v18 = vld [vmem:[%s3280_s16 + $0x40] sm:$0xff] (!%p1128_p3)   ;;  %v1132_v19 = vld [vmem:[#allocation3] sm:$0xff] (!%p1128_p3)  ;;  %s1489_s21 = scalar_lea.vmem (!%p1128_p3), [#allocation2], %s2417_s7 }
 0x36c   : > { %2622 = vmatpush3.bf16.msra.mxu0 (!%p1128_p3), %v2877_v14  ;;  %2601 = vmatprep.subr.bf16.mxu1 (!%p1128_p3), %v2885_v18  ;;  %v2887_v20 = vld [vmem:[%s3280_s16 + $0x48] sm:$0xff] (!%p1128_p3)   ;;  %v2881_v21 = vld [vmem:[%s3280_s16 + $0x20] sm:$0xff] (!%p1128_p3)   ;;  %v2889_v22 = vld [vmem:[%s3280_s16 + $0x50] sm:$0xff] (!%p1128_p3)  }
 0x36d   : > { %2623 = vmatprep.subr.bf16.mxu0 (!%p1128_p3), %v2878_v15  ;;  %2637 = vmatprep.mubr.bf16.mxu0 (!%p1128_p3), %v1132_v19  ;;  %v2882_v23 = vld [vmem:[%s3280_s16 + $0x28] sm:$0xff] (!%p1128_p3)   ;;  %v2891_v24 = vld [vmem:[%s3280_s16 + $0x58] sm:$0xff] (!%p1128_p3)   ;;  %v2883_v25 = vld [vmem:[%s3280_s16 + $0x30] sm:$0xff] (!%p1128_p3)  }
 0x36e   : > { %2602 = vmatpush3.bf16.msra.mxu1 (!%p1128_p3), %v2885_v18  ;;  %v2893_v26 = vld [vmem:[%s3280_s16 + $0x60] sm:$0xff] (!%p1128_p3)   ;;  %v2884_v27 = vld [vmem:[%s3280_s16 + $0x38] sm:$0xff] (!%p1128_p3)   ;;  %v2895_v29 = vld [vmem:[%s3280_s16 + $0x68] sm:$0xff] (!%p1128_p3)  }
 0x36f   : > { %2603 = vmatprep.subr.bf16.mxu1 (!%p1128_p3), %v2887_v20  ;;  %v1151_v28 = vld [vmem:[#allocation3 + $0x10] sm:$0xff] (!%p1128_p3)  ;;  %v2897_v31 = vld [vmem:[%s3280_s16 + $0x70] sm:$0xff] (!%p1128_p3)   ;;  %v1133_v32 = vld [vmem:[#allocation3 + $0x8] sm:$0xff] (!%p1128_p3) }
 0x370   : > { %2624 = vmatpush3.bf16.msra.mxu0 (!%p1128_p3), %v2878_v15  ;;  %2617 = vmatprep.mubr.bf16.mxu1 (!%p1128_p3), %v1151_v28  ;;  %v2886_v30 = vld [vmem:[%s3280_s16 + $0x80] sm:$0xff] (!%p1128_p3)   ;;  %v2888_v33 = vld [vmem:[%s3280_s16 + $0x88] sm:$0xff] (!%p1128_p3)   ;;  %v2899_v34 = vld [vmem:[%s3280_s16 + $0x78] sm:$0xff] (!%p1128_p3)  }
 0x371   : > { %2625 = vmatprep.subr.bf16.mxu0 (!%p1128_p3), %v2879_v16  ;;  %v1364_v35 = vld [vmem:[#allocation3 + $0x20] sm:$0xff] (!%p1128_p3)  ;;  %v1152_v37 = vld [vmem:[#allocation3 + $0x18] sm:$0xff] (!%p1128_p3)  ;;  %v2892_v38 = vld [vmem:[%s3280_s16 + $0x98] sm:$0xff] (!%p1128_p3)  }
 0x372   : > { %2604 = vmatpush3.bf16.msra.mxu1 %v2887_v20  ;;  %v2890_v36 = vld [vmem:[%s3280_s16 + $0x90] sm:$0xff]   ;;  %v2894_v39 = vld [vmem:[%s3280_s16 + $0xa0] sm:$0xff]   ;;  %v2896_v40 = vld [vmem:[%s3280_s16 + $0xa8] sm:$0xff]   ;;  %s2369_s27 = sshll.u32 (!%p2286_p6), %s2995_s18, 5 }
 0x373   : > { %2605 = vmatprep.subr.bf16.mxu1 %v2889_v22  ;;  %v2898_v41 = vld [vmem:[%s3280_s16 + $0xb0] sm:$0xff]   ;;  %v2900_v42 = vld [vmem:[%s3280_s16 + $0xb8] sm:$0xff]   ;;  %v1491_v50 = vld [vmem:[%s1489_s21 + $0x8] sm:$0xff]  ;;  %s1574_s29 = scalar_lea.vmem (!%p2286_p6), [#allocation4], %s2369_s27 }
 0x374   : > { %2626 = vmatpush3.bf16.msra.mxu0 %v2879_v16  ;;  %v1365_v43 = vld [vmem:[#allocation3 + $0x28] sm:$0xff]  ;;  %v1490_v57 = vld [vmem:[%s1489_s21] sm:$0xff]  ;;  %v1494_v61 = vunpack.c.l.bf16 %v1491_v50  ;;  %v1495_v63 = vunpack.c.h.bf16 %v1491_v50 }
 0x375   : > { %2627 = vmatprep.subr.bf16.mxu0 %v2880_v17  ;;  %v1492_v2 = vunpack.c.l.bf16 %v1490_v57  ;;  %v1493_v4 = vunpack.c.h.bf16 %v1490_v57 }
 0x376   : > { %2606 = vmatpush3.bf16.msra.mxu1 %v2889_v22 }
 0x377   : > { %2607 = vmatprep.subr.bf16.mxu1 %v2891_v24 }
 0x378   : > { %2628 = vmatpush3.bf16.msra.mxu0 %v2880_v17 }
 0x379   : > { %2629 = vmatprep.subr.bf16.mxu0 %v2881_v21 }
 0x37a   : > { %2608 = vmatpush3.bf16.msra.mxu1 %v2891_v24 }
 0x37b   : > { %2609 = vmatprep.subr.bf16.mxu1 %v2893_v26 }
 0x37c   : > { %2630 = vmatpush3.bf16.msra.mxu0 %v2881_v21 }
 0x37d   : > { %2631 = vmatprep.subr.bf16.mxu0 %v2882_v23 }
 0x37e   : > { %2610 = vmatpush3.bf16.msra.mxu1 %v2893_v26 }
 0x37f   : > { %2611 = vmatprep.subr.bf16.mxu1 %v2895_v29 }
 0x380   : > { %2632 = vmatpush3.bf16.msra.mxu0 %v2882_v23 }
 0x381   : > { %2633 = vmatprep.subr.bf16.mxu0 %v2883_v25 }
 0x382   : > { %2612 = vmatpush3.bf16.msra.mxu1 %v2895_v29 }
 0x383   : > { %2613 = vmatprep.subr.bf16.mxu1 %v2897_v31 }
 0x384   : > { %2634 = vmatpush3.bf16.msra.mxu0 %v2883_v25 }
 0x385   : > { %2635 = vmatprep.subr.bf16.mxu0 %v2884_v27 }
 0x386   : > { %2614 = vmatpush3.bf16.msra.mxu1 %v2897_v31 }
 0x387   : > { %2615 = vmatprep.subr.bf16.mxu1 %v2899_v34 }
 0x388   : > { %2636 = vmatpush3.bf16.msra.mxu0 %v2884_v27 }
 0x389   : > { %2641 = vmatprep.subr.bf16.mxu0 %v2886_v30 }
 0x38a   : > { %2616 = vmatpush3.bf16.msra.mxu1 %v2899_v34 }
 0x38b   : > { %2638 = vmatmul.mubr.bf16.vlgmr.msra.gmra.mrb[0].mxu0 %v1133_v32 }
 0x38c   : > { %2642 = vmatpush3.bf16.msra.mxu0 %v2886_v30  ;;  %2657 = vmatprep.mubr.bf16.mxu0 %v1364_v35 }
 0x38d   : > { %2643 = vmatprep.subr.bf16.mxu0 %v2888_v33  ;;  %2618 = vmatmul.mubr.bf16.vlgmr.msra.gmra.mrb[0].mxu1 %v1152_v37 }
 0x38e   : > { %2665 = vmatprep.mubr.msk.bf16.mxu1 %vm1514_vm2, %v2364_v44 }
 0x390   : > { %2644 = vmatpush3.bf16.msra.mxu0 %v2888_v33 }
 0x391   : > { %2645 = vmatprep.subr.bf16.mxu0 %v2890_v36 }
 0x394   : > { %2646 = vmatpush3.bf16.msra.mxu0 %v2890_v36 }
 0x395   : > { %2647 = vmatprep.subr.bf16.mxu0 %v2892_v38 }
 0x398   : > { %2648 = vmatpush3.bf16.msra.mxu0 %v2892_v38 }
 0x399   : > { %2649 = vmatprep.subr.bf16.mxu0 %v2894_v39 }
 0x39c   : > { %2650 = vmatpush3.bf16.msra.mxu0 %v2894_v39 }
 0x39d   : > { %2651 = vmatprep.subr.bf16.mxu0 %v2896_v40 }
 0x3a0   : > { %2652 = vmatpush3.bf16.msra.mxu0 %v2896_v40 }
 0x3a1   : > { %2653 = vmatprep.subr.bf16.mxu0 %v2898_v41 }
 0x3a4   : > { %2654 = vmatpush3.bf16.msra.mxu0 %v2898_v41 }
 0x3a5   : > { %2655 = vmatprep.subr.bf16.mxu0 %v2900_v42 }
 0x3a8   : > { %2656 = vmatpush3.bf16.msra.mxu0 %v2900_v42 }
 0x3ab   : > { %2658 = vmatmul.mubr.bf16.vlgmr.msra.gmra.mrb[0].mxu0 %v1365_v43 }
 0x460   : > { %v2619_v45 = vpop.f32.mrb[0].mxu1 }
 0x461   : > { %v1251_v46 = vpop.f32.mrb[1].mxu1 }
 0x462   : > { %v2620_v47 = vpop.f32.mrb[2].mxu1 }
 0x463   : > { %v1254_v48 = vpop.f32.mrb[3].mxu1 }
 0x47e   : > { %v2659_v49 = vpop.f32.mrb[0].mxu0 }
 0x47f   : > { %v2745_v51 = vadd.f32 %v2659_v49, %v2619_v45  ;;  %v1464_v56 = vpop.f32.mrb[1].mxu0 }
 0x480   : > { %v2746_v58 = vadd.f32 %v1464_v56, %v1251_v46  ;;  %v2660_v59 = vpop.f32.mrb[2].mxu0 }
 0x481   : > { %v1485_v60 = vmul.f32 2.0, %v2745_v51  ;;  %v2747_v62 = vadd.f32 %v2660_v59, %v2620_v47  ;;  %v1467_v0 = vpop.f32.mrb[3].mxu0 }
 0x482   : > { %v1483_v1 = vmul.f32 2.0, %v2746_v58  ;;  %v2748_v3 = vadd.f32 %v1467_v0, %v1254_v48 }
 0x483   : > { %v1486_v5 = vmul.f32 2.0, %v2747_v62  ;;  %v1498_v7 = vsub.f32 %v1485_v60, %v1494_v61 }
 0x484   : > { %v1484_v6 = vmul.f32 2.0, %v2748_v3  ;;  %v1496_v9 = vsub.f32 %v1483_v1, %v1492_v2 }
 0x485   : > { %v1499_v8 = vsub.f32 %v1486_v5, %v1495_v63 }
 0x486   : > { %v1497_v10 = vsub.f32 %v1484_v6, %v1493_v4 }
 0x487   : > { %v1501_v11 = vpack.c.bf16 %v1499_v8, %v1498_v7 }
 0x488   : > { %v1500_v12 = vpack.c.bf16 %v1497_v10, %v1496_v9 }
 0x489   : > { %1503 = vst [vmem:[%s1489_s21 + $0x8] sm:$0xff] %v1501_v11 }
 0x48a   : > { %1502 = vst [vmem:[%s1489_s21] sm:$0xff] %v1500_v12  ;;  %2661 = vmatprep.subr.bf16.mxu1 %v1500_v12 }
 0x48b   : > { %2662 = vmatpush3.bf16.msra.mxu1 %v1500_v12 }
 0x48c   : > { %2663 = vmatprep.subr.bf16.mxu1 %v1501_v11 }
 0x48f   : > { %2664 = vmatpush3.bf16.msra.mxu1 %v1501_v11 }
 0x492   : > { %2666 = vmatmul.mubr.msk.bf16.vlgmr.msra.gmra.mrb[4].mxu1 %vm1514_vm2, %v2365_v13 }
 0x562   : > { %1572 = sbr.rel (%p2286_p6) target bundleno = 1386 (0x56a), region = 150 }
 0x565   : > { %v2667_v14 = vpop.f32.mrb[4].mxu1 }
 0x566   : > { %v1555_v15 = vpop.f32.mrb[5].mxu1  ;;  %1577 = vst [vmem:[%s1574_s29 + $0x10] sm:$0xff] (!%p2286_p6), %v2667_v14 }
 0x567   : > { %v2668_v16 = vpop.f32.mrb[6].mxu1  ;;  %1575 = vst [vmem:[%s1574_s29] sm:$0xff] (!%p2286_p6), %v1555_v15 }
 0x568   : > { %v1558_v17 = vpop.f32.mrb[7].mxu1  ;;  %1578 = vst [vmem:[%s1574_s29 + $0x18] sm:$0xff] (!%p2286_p6), %v2668_v16 }
 0x569   : > { %1576 = vst [vmem:[%s1574_s29 + $0x8] sm:$0xff] %v1558_v17 }
 0x56a PF: > { %p2370_p4 = scmp.le.s32.totalorder %s2999_s19, 0 }
 0x56b   : > { %s2371_s9 = sshll.u32 (!%p2370_p4), %s2995_s18, 5 }
 0x56c   : > { %1582 = sbr.rel (%p2370_p4) target bundleno = 1397 (0x575), region = 154  ;;  %s1584_s26 = scalar_lea.vmem (!%p2370_p4), [#allocation4], %s2371_s9 }
 0x570   : > { %v1585_v18 = vld [vmem:[%s1584_s26] sm:$0xff] (!%p2370_p4)  ;;  %v1586_v19 = vld [vmem:[%s1584_s26 + $0x8] sm:$0xff] (!%p2370_p4)  ;;  %v1587_v20 = vld [vmem:[%s1584_s26 + $0x10] sm:$0xff] (!%p2370_p4) }
 0x571   : > { %v1589_v21 = vadd.f32 (!%p2370_p4), %v1585_v18, %v1555_v15  ;;  %v1590_v22 = vadd.f32 (!%p2370_p4), %v1586_v19, %v1558_v17  ;;  %v1591_v23 = vadd.f32 (!%p2370_p4), %v2667_v14, %v1587_v20  ;;  %v1588_v24 = vld [vmem:[%s1584_s26 + $0x18] sm:$0xff] (!%p2370_p4) }
 0x572   : > { %v1592_v25 = vadd.f32 (!%p2370_p4), %v2668_v16, %v1588_v24 }
 0x573   : > { %1593 = vst [vmem:[%s1584_s26] sm:$0xff] %v1589_v21  ;;  %1594 = vst [vmem:[%s1584_s26 + $0x8] sm:$0xff] %v1590_v22 }
 0x574   : > { %1595 = vst [vmem:[%s1584_s26 + $0x10] sm:$0xff] %v1591_v23  ;;  %1596 = vst [vmem:[%s1584_s26 + $0x18] sm:$0xff] %v1592_v25 }
 0x575 PF: > { %p2372_p5 = scmp.ne.s32.totalorder %s2999_s19, 2 }
 0x576   : > { %s2373_s28 = sshll.u32 (!%p2372_p5), %s2995_s18, 5 }
 0x577   : > { %1600 = sbr.rel (%p2372_p5) target bundleno = 1406 (0x57e), region = 158  ;;  %s1602_s6 = scalar_lea.vmem (!%p2372_p5), [#allocation4], %s2373_s28 }
 0x57b   : > { %v1603_v26 = vld [vmem:[%s1602_s6] sm:$0xff] (!%p2372_p5)  ;;  %v1604_v27 = vld [vmem:[%s1602_s6 + $0x8] sm:$0xff] (!%p2372_p5)  ;;  %v1605_v28 = vld [vmem:[%s1602_s6 + $0x10] sm:$0xff] (!%p2372_p5) }
 0x57c   : > { %1607 = vst [vmem:[%s3282_s12] sm:$0xff] (!%p2372_p5), %v1603_v26  ;;  %1608 = vst [vmem:[%s3282_s12 + $0x8] sm:$0xff] (!%p2372_p5), %v1604_v27  ;;  %v1606_v29 = vld [vmem:[%s1602_s6 + $0x18] sm:$0xff] (!%p2372_p5) }
 0x57d   : > { %1609 = vst [vmem:[%s3282_s12 + $0x10] sm:$0xff] (!%p2372_p5), %v1605_v28  ;;  %1610 = vst [vmem:[%s3282_s12 + $0x18] sm:$0xff] (!%p2372_p5), %v1606_v29 }
 0x57e PF: > { %p1611_p7 = scmp.eq.s32.totalorder %s3530_s23, 1 }
 0x580   : > { %p1612_p8 = pnand %p1611_p7, %p1114_p1 }
 0x581   : > { %v2901_v30 = vld [vmem:[%s3280_s16] sm:$0xff] (!%p1612_p8)   ;;  %v2902_v31 = vld [vmem:[%s3280_s16 + $0x8] sm:$0xff] (!%p1612_p8)   ;;  %v2903_v32 = vld [vmem:[%s3280_s16 + $0x10] sm:$0xff] (!%p1612_p8)   ;;  %v2400_v0 = vcombine.low (!%p1612_p8), %v3272_v52, %v3274_v53  ;;  %vm1998_vm3 = vcmask (!%p1612_p8), 261120   ;;  %s2418_s14 = sshll.u32 (!%p1612_p8), %s2995_s18, 4  ;;  %v2401_v27 = vcombine.low (!%p1612_p8), %v3276_v54, %v3278_v55 }
 0x582   : > { %1615 = sbr.rel (%p1612_p8) target bundleno = 1941 (0x795), region = 162  ;;  %2689 = vmatprep.subr.bf16.mxu0 (!%p1612_p8), %v2901_v30  ;;  %v2904_v33 = vld [vmem:[%s3280_s16 + $0x18] sm:$0xff] (!%p1612_p8)   ;;  %v2909_v34 = vld [vmem:[%s3280_s16 + $0x40] sm:$0xff] (!%p1612_p8)   ;;  %v2911_v36 = vld [vmem:[%s3280_s16 + $0x48] sm:$0xff] (!%p1612_p8)   ;;  %s1973_s4 = scalar_lea.vmem (!%p1612_p8), [#allocation3], %s2418_s14 }
 0x583   : > { %2690 = vmatpush3.bf16.msra.mxu0 (!%p1612_p8), %v2901_v30  ;;  %v1616_v35 = vld [vmem:[#allocation2] sm:$0xff] (!%p1612_p8)  ;;  %2669 = vmatprep.subr.bf16.mxu1 (!%p1612_p8), %v2909_v34  ;;  %v2913_v38 = vld [vmem:[%s3280_s16 + $0x50] sm:$0xff] (!%p1612_p8)   ;;  %v2906_v39 = vld [vmem:[%s3280_s16 + $0x28] sm:$0xff] (!%p1612_p8)  }
 0x584   : > { %2691 = vmatprep.subr.bf16.mxu0 (!%p1612_p8), %v2902_v31  ;;  %2705 = vmatprep.mubr.bf16.mxu0 (!%p1612_p8), %v1616_v35  ;;  %v2905_v37 = vld [vmem:[%s3280_s16 + $0x20] sm:$0xff] (!%p1612_p8)   ;;  %v2915_v40 = vld [vmem:[%s3280_s16 + $0x58] sm:$0xff] (!%p1612_p8)   ;;  %v2907_v41 = vld [vmem:[%s3280_s16 + $0x30] sm:$0xff] (!%p1612_p8)  }
 0x585   : > { %2670 = vmatpush3.bf16.msra.mxu1 (!%p1612_p8), %v2909_v34  ;;  %v2917_v42 = vld [vmem:[%s3280_s16 + $0x60] sm:$0xff] (!%p1612_p8)   ;;  %v2908_v43 = vld [vmem:[%s3280_s16 + $0x38] sm:$0xff] (!%p1612_p8)   ;;  %v1635_v44 = vld [vmem:[#allocation2 + $0x10] sm:$0xff] (!%p1612_p8) }
 0x586   : > { %2671 = vmatprep.subr.bf16.mxu1 (!%p1612_p8), %v2911_v36  ;;  %v2919_v45 = vld [vmem:[%s3280_s16 + $0x68] sm:$0xff] (!%p1612_p8)   ;;  %2685 = vmatprep.mubr.bf16.mxu1 (!%p1612_p8), %v1635_v44  ;;  %v2910_v46 = vld [vmem:[%s3280_s16 + $0x80] sm:$0xff] (!%p1612_p8)   ;;  %v2921_v47 = vld [vmem:[%s3280_s16 + $0x70] sm:$0xff] (!%p1612_p8)  }
 0x587   : > { %2692 = vmatpush3.bf16.msra.mxu0 (!%p1612_p8), %v2902_v31  ;;  %v1617_v48 = vld [vmem:[#allocation2 + $0x8] sm:$0xff] (!%p1612_p8)  ;;  %v2923_v50 = vld [vmem:[%s3280_s16 + $0x78] sm:$0xff] (!%p1612_p8)   ;;  %v1848_v51 = vld [vmem:[#allocation2 + $0x20] sm:$0xff] (!%p1612_p8) }
 0x588   : > { %2693 = vmatprep.subr.bf16.mxu0 (!%p1612_p8), %v2903_v32  ;;  %v2912_v49 = vld [vmem:[%s3280_s16 + $0x88] sm:$0xff] (!%p1612_p8)   ;;  %v2914_v56 = vld [vmem:[%s3280_s16 + $0x90] sm:$0xff] (!%p1612_p8)   ;;  %v1636_v57 = vld [vmem:[#allocation2 + $0x18] sm:$0xff] (!%p1612_p8) }
 0x589   : > { %2672 = vmatpush3.bf16.msra.mxu1 %v2911_v36  ;;  %v2916_v58 = vld [vmem:[%s3280_s16 + $0x98] sm:$0xff]   ;;  %v2918_v59 = vld [vmem:[%s3280_s16 + $0xa0] sm:$0xff]   ;;  %v2920_v60 = vld [vmem:[%s3280_s16 + $0xa8] sm:$0xff]  }
 0x58a   : > { %2673 = vmatprep.subr.bf16.mxu1 %v2913_v38  ;;  %v2922_v61 = vld [vmem:[%s3280_s16 + $0xb0] sm:$0xff]   ;;  %v2924_v62 = vld [vmem:[%s3280_s16 + $0xb8] sm:$0xff]   ;;  %v1849_v63 = vld [vmem:[#allocation2 + $0x28] sm:$0xff]  ;;  %s2405_s16 = sshll.u32 (!%p2286_p6), %s2995_s18, 5 }
 0x58b   : > { %2694 = vmatpush3.bf16.msra.mxu0 %v2903_v32  ;;  %v1975_v6 = vld [vmem:[%s1973_s4 + $0x8] sm:$0xff]  ;;  %v1974_v9 = vld [vmem:[%s1973_s4] sm:$0xff]  ;;  %s2058_s8 = scalar_lea.vmem (!%p2286_p6), [#allocation4], %s2405_s16 }
 0x58c   : > { %2695 = vmatprep.subr.bf16.mxu0 %v2904_v33  ;;  %v1978_v13 = vunpack.c.l.bf16 %v1975_v6  ;;  %v1979_v52 = vunpack.c.h.bf16 %v1975_v6  ;;  %v1976_v16 = vunpack.c.l.bf16 %v1974_v9  ;;  %v1977_v18 = vunpack.c.h.bf16 %v1974_v9 }
 0x58d   : > { %2674 = vmatpush3.bf16.msra.mxu1 %v2913_v38 }
 0x58e   : > { %2675 = vmatprep.subr.bf16.mxu1 %v2915_v40 }
 0x58f   : > { %2696 = vmatpush3.bf16.msra.mxu0 %v2904_v33 }
 0x590   : > { %2697 = vmatprep.subr.bf16.mxu0 %v2905_v37 }
 0x591   : > { %2676 = vmatpush3.bf16.msra.mxu1 %v2915_v40 }
 0x592   : > { %2677 = vmatprep.subr.bf16.mxu1 %v2917_v42 }
 0x593   : > { %2698 = vmatpush3.bf16.msra.mxu0 %v2905_v37 }
 0x594   : > { %2699 = vmatprep.subr.bf16.mxu0 %v2906_v39 }
 0x595   : > { %2678 = vmatpush3.bf16.msra.mxu1 %v2917_v42 }
 0x596   : > { %2679 = vmatprep.subr.bf16.mxu1 %v2919_v45 }
 0x597   : > { %2700 = vmatpush3.bf16.msra.mxu0 %v2906_v39 }
 0x598   : > { %2701 = vmatprep.subr.bf16.mxu0 %v2907_v41 }
 0x599   : > { %2680 = vmatpush3.bf16.msra.mxu1 %v2919_v45 }
 0x59a   : > { %2681 = vmatprep.subr.bf16.mxu1 %v2921_v47 }
 0x59b   : > { %2702 = vmatpush3.bf16.msra.mxu0 %v2907_v41 }
 0x59c   : > { %2703 = vmatprep.subr.bf16.mxu0 %v2908_v43 }
 0x59d   : > { %2682 = vmatpush3.bf16.msra.mxu1 %v2921_v47 }
 0x59e   : > { %2683 = vmatprep.subr.bf16.mxu1 %v2923_v50 }
 0x59f   : > { %2704 = vmatpush3.bf16.msra.mxu0 %v2908_v43 }
 0x5a0   : > { %2709 = vmatprep.subr.bf16.mxu0 %v2910_v46 }
 0x5a1   : > { %2684 = vmatpush3.bf16.msra.mxu1 %v2923_v50 }
 0x5a2   : > { %2706 = vmatmul.mubr.bf16.vlgmr.msra.gmra.mrb[0].mxu0 %v1617_v48 }
 0x5a3   : > { %2710 = vmatpush3.bf16.msra.mxu0 %v2910_v46  ;;  %2725 = vmatprep.mubr.bf16.mxu0 %v1848_v51 }
 0x5a4   : > { %2711 = vmatprep.subr.bf16.mxu0 %v2912_v49  ;;  %2686 = vmatmul.mubr.bf16.vlgmr.msra.gmra.mrb[0].mxu1 %v1636_v57 }
 0x5a5   : > { %2733 = vmatprep.mubr.msk.bf16.mxu1 %vm1998_vm3, %v2400_v0 }
 0x5a7   : > { %2712 = vmatpush3.bf16.msra.mxu0 %v2912_v49 }
 0x5a8   : > { %2713 = vmatprep.subr.bf16.mxu0 %v2914_v56 }
 0x5ab   : > { %2714 = vmatpush3.bf16.msra.mxu0 %v2914_v56 }
 0x5ac   : > { %2715 = vmatprep.subr.bf16.mxu0 %v2916_v58 }
 0x5af   : > { %2716 = vmatpush3.bf16.msra.mxu0 %v2916_v58 }
 0x5b0   : > { %2717 = vmatprep.subr.bf16.mxu0 %v2918_v59 }
 0x5b3   : > { %2718 = vmatpush3.bf16.msra.mxu0 %v2918_v59 }
 0x5b4   : > { %2719 = vmatprep.subr.bf16.mxu0 %v2920_v60 }
 0x5b7   : > { %2720 = vmatpush3.bf16.msra.mxu0 %v2920_v60 }
 0x5b8   : > { %2721 = vmatprep.subr.bf16.mxu0 %v2922_v61 }
 0x5bb   : > { %2722 = vmatpush3.bf16.msra.mxu0 %v2922_v61 }
 0x5bc   : > { %2723 = vmatprep.subr.bf16.mxu0 %v2924_v62 }
 0x5bf   : > { %2724 = vmatpush3.bf16.msra.mxu0 %v2924_v62 }
 0x5c2   : > { %2726 = vmatmul.mubr.bf16.vlgmr.msra.gmra.mrb[0].mxu0 %v1849_v63 }
 0x677   : > { %v2687_v1 = vpop.f32.mrb[0].mxu1 }
 0x678   : > { %v1735_v2 = vpop.f32.mrb[1].mxu1 }
 0x679   : > { %v2688_v3 = vpop.f32.mrb[2].mxu1 }
 0x67a   : > { %v1738_v4 = vpop.f32.mrb[3].mxu1 }
 0x695   : > { %v2727_v5 = vpop.f32.mrb[0].mxu0 }
 0x696   : > { %v2753_v7 = vadd.f32 %v2727_v5, %v2687_v1  ;;  %v1948_v8 = vpop.f32.mrb[1].mxu0 }
 0x697   : > { %v2754_v10 = vadd.f32 %v1948_v8, %v1735_v2  ;;  %v2728_v11 = vpop.f32.mrb[2].mxu0 }
 0x698   : > { %v1969_v12 = vmul.f32 2.0, %v2753_v7  ;;  %v2755_v14 = vadd.f32 %v2728_v11, %v2688_v3  ;;  %v1951_v53 = vpop.f32.mrb[3].mxu0 }
 0x699   : > { %v1967_v15 = vmul.f32 2.0, %v2754_v10  ;;  %v2756_v17 = vadd.f32 %v1951_v53, %v1738_v4 }
 0x69a   : > { %v1970_v19 = vmul.f32 2.0, %v2755_v14  ;;  %v1982_v21 = vsub.f32 %v1969_v12, %v1978_v13 }
 0x69b   : > { %v1968_v20 = vmul.f32 2.0, %v2756_v17  ;;  %v1980_v23 = vsub.f32 %v1967_v15, %v1976_v16 }
 0x69c   : > { %v1983_v22 = vsub.f32 %v1970_v19, %v1979_v52 }
 0x69d   : > { %v1981_v24 = vsub.f32 %v1968_v20, %v1977_v18 }
 0x69e   : > { %v1985_v25 = vpack.c.bf16 %v1983_v22, %v1982_v21 }
 0x69f   : > { %v1984_v26 = vpack.c.bf16 %v1981_v24, %v1980_v23 }
 0x6a0   : > { %1987 = vst [vmem:[%s1973_s4 + $0x8] sm:$0xff] %v1985_v25 }
 0x6a1   : > { %1986 = vst [vmem:[%s1973_s4] sm:$0xff] %v1984_v26  ;;  %2729 = vmatprep.subr.bf16.mxu1 %v1984_v26 }
 0x6a2   : > { %2730 = vmatpush3.bf16.msra.mxu1 %v1984_v26 }
 0x6a3   : > { %2731 = vmatprep.subr.bf16.mxu1 %v1985_v25 }
 0x6a6   : > { %2732 = vmatpush3.bf16.msra.mxu1 %v1985_v25 }
 0x6a9   : > { %2734 = vmatmul.mubr.msk.bf16.vlgmr.msra.gmra.mrb[4].mxu1 %vm1998_vm3, %v2401_v27 }
 0x779   : > { %2056 = sbr.rel (%p2286_p6) target bundleno = 1921 (0x781), region = 166 }
 0x77c   : > { %v2735_v28 = vpop.f32.mrb[4].mxu1 }
 0x77d   : > { %v2039_v29 = vpop.f32.mrb[5].mxu1  ;;  %2061 = vst [vmem:[%s2058_s8 + $0x10] sm:$0xff] (!%p2286_p6), %v2735_v28 }
 0x77e   : > { %v2736_v30 = vpop.f32.mrb[6].mxu1  ;;  %2059 = vst [vmem:[%s2058_s8] sm:$0xff] (!%p2286_p6), %v2039_v29 }
 0x77f   : > { %v2042_v31 = vpop.f32.mrb[7].mxu1  ;;  %2062 = vst [vmem:[%s2058_s8 + $0x18] sm:$0xff] (!%p2286_p6), %v2736_v30 }
 0x780   : > { %2060 = vst [vmem:[%s2058_s8 + $0x8] sm:$0xff] %v2042_v31 }
 0x781 PF: > { %p2406_p9 = scmp.le.s32.totalorder %s2999_s19, 0 }
 0x782   : > { %s2407_s30 = sshll.u32 (!%p2406_p9), %s2995_s18, 5 }
 0x783   : > { %2066 = sbr.rel (%p2406_p9) target bundleno = 1932 (0x78c), region = 170  ;;  %s2068_s23 = scalar_lea.vmem (!%p2406_p9), [#allocation4], %s2407_s30 }
 0x787   : > { %v2069_v54 = vld [vmem:[%s2068_s23] sm:$0xff] (!%p2406_p9)  ;;  %v2070_v55 = vld [vmem:[%s2068_s23 + $0x8] sm:$0xff] (!%p2406_p9)  ;;  %v2071_v32 = vld [vmem:[%s2068_s23 + $0x10] sm:$0xff] (!%p2406_p9) }
 0x788   : > { %v2073_v33 = vadd.f32 (!%p2406_p9), %v2069_v54, %v2039_v29  ;;  %v2074_v34 = vadd.f32 (!%p2406_p9), %v2070_v55, %v2042_v31  ;;  %v2075_v35 = vadd.f32 (!%p2406_p9), %v2735_v28, %v2071_v32  ;;  %v2072_v36 = vld [vmem:[%s2068_s23 + $0x18] sm:$0xff] (!%p2406_p9) }
 0x789   : > { %v2076_v37 = vadd.f32 (!%p2406_p9), %v2736_v30, %v2072_v36 }
 0x78a   : > { %2077 = vst [vmem:[%s2068_s23] sm:$0xff] %v2073_v33  ;;  %2078 = vst [vmem:[%s2068_s23 + $0x8] sm:$0xff] %v2074_v34 }
 0x78b   : > { %2079 = vst [vmem:[%s2068_s23 + $0x10] sm:$0xff] %v2075_v35  ;;  %2080 = vst [vmem:[%s2068_s23 + $0x18] sm:$0xff] %v2076_v37 }
 0x78c PF: > { %p2408_p6 = scmp.ne.s32.totalorder %s2999_s19, 2 }
 0x78d   : > { %s2409_s7 = sshll.u32 (!%p2408_p6), %s2995_s18, 5 }
 0x78e   : > { %2084 = sbr.rel (%p2408_p6) target bundleno = 1941 (0x795), region = 174  ;;  %s2086_s21 = scalar_lea.vmem (!%p2408_p6), [#allocation4], %s2409_s7 }
 0x792   : > { %v2087_v38 = vld [vmem:[%s2086_s21] sm:$0xff] (!%p2408_p6)  ;;  %v2088_v39 = vld [vmem:[%s2086_s21 + $0x8] sm:$0xff] (!%p2408_p6)  ;;  %v2089_v40 = vld [vmem:[%s2086_s21 + $0x10] sm:$0xff] (!%p2408_p6) }
 0x793   : > { %2091 = vst [vmem:[%s3282_s12] sm:$0xff] (!%p2408_p6), %v2087_v38  ;;  %2092 = vst [vmem:[%s3282_s12 + $0x8] sm:$0xff] (!%p2408_p6), %v2088_v39  ;;  %v2090_v41 = vld [vmem:[%s2086_s21 + $0x18] sm:$0xff] (!%p2408_p6) }
 0x794   : > { %2093 = vst [vmem:[%s3282_s12 + $0x10] sm:$0xff] (!%p2408_p6), %v2089_v40  ;;  %2094 = vst [vmem:[%s3282_s12 + $0x18] sm:$0xff] (!%p2408_p6), %v2090_v41 }
 0x795 PF: > { %2101 = sbr.rel (!%p3143_p0) target bundleno = 1949 (0x79d), region = 178  ;;  %s2411_s19 = sshll.u32 (%p3143_p0), %s2995_s18, 3 }
 0x796   : > { %s2103_s9 = scalar_lea.vmem (%p3143_p0), %s3502_s3, %s2411_s19 }
 0x79a   : > { %v2137_v42 = vld [vmem:[%s3282_s12] sm:$0xff] (%p3143_p0)  ;;  %v2139_v43 = vld [vmem:[%s3282_s12 + $0x8] sm:$0xff] (%p3143_p0) }
 0x79b   : > { %v2141_v44 = vld [vmem:[%s3282_s12 + $0x10] sm:$0xff] (%p3143_p0)  ;;  %v2143_v45 = vld [vmem:[%s3282_s12 + $0x18] sm:$0xff] (%p3143_p0)  ;;  %2138 = vst [vmem:[%s2103_s9] sm:$0xff] (%p3143_p0), %v2137_v42  ;;  %2140 = vst [vmem:[%s2103_s9 + $0x18] sm:$0xff] (%p3143_p0), %v2139_v43 }
 0x79c   : > { %2142 = vst [vmem:[%s2103_s9 + $0x30] sm:$0xff] %v2141_v44  ;;  %2144 = vst [vmem:[%s2103_s9 + $0x48] sm:$0xff] %v2143_v45 }
 0x79d PF: > { %s13_s22 = sadd.s32 1, %s3011_s22   ;;  %s3511_s19 = sld [smem:[#allocation8_spill]] }
 0x79e   : > { %p10_p0 = scmp.ge.s32.totalorder %s13_s22, 11   ;;  %s3512_s21 = sld [smem:[#allocation9_spill]] }
 0x79f   : > { %s3513_s12 = smov %s2975_s13  ;;  %s3514_s13 = smov %s3139_s25 }
 0x7a0   : > { %s3515_s14 = smov %s2983_s15  ;;  %s3516_s15 = smov %s3133_s11 }
 0x7a1   : > { %s3517_s16 = smov %s2991_s17  ;;  %s3518_s17 = smov %s3130_s10 }
 0x7a2   : > { %s3519_s18 = smov %s3003_s20  ;;  %s3520_s20 = smov %s3522_s24 }
 0x7a3   :  { %12 = sbr.rel (!%p10_p0) target bundleno = 6 (0x6), region = 278 }

</bundles_post_ra>
